<compile_context>
chip_gen: v6e
topology: v6e:2x2x1
jax: 0.10.0
libtpu: 0.0.40
codegen_flags: <defaults>
</compile_context>

<pallas_src>
import jax
import jax.numpy as jnp
from jax.experimental import pallas as pl
from jax.experimental.pallas import tpu as pltpu

AVG = 3          # avgPoolLen
MULT = 2         # multiFact
K = 6            # timeSmootherLen
MM = MULT * MULT
LN_EPS = 1e-3    # stratified_layerNorm eps (added to std)
L2_EPS = 1e-12   # F.normalize eps

# Row offsets inside the packed parameter block (see wrapper).
R_W1 = 0                   # rows [0, MULT*K)        : w1[mi, k]
R_B1 = R_W1 + MULT * K     # rows [R_B1, R_B1+MULT)  : b1[mi]
R_W2 = R_B1 + MULT         # rows [R_W2, R_W2+MM*K)  : w2[idx, k], idx = mi*MULT+mj
R_B2 = R_W2 + MM * K       # rows [R_B2, R_B2+MM)    : b2[idx]
R_TOT = R_B2 + MM          # 42 rows total


def _clisa_proj_kernel(x_ref, p_ref, o_ref):
    # x_ref: (G, NS, AVG, Cin, Tp)  -- time on lanes, pool window on a leading axis
    # p_ref: (R_TOT, Cin, T1)       -- packed conv params, pre-broadcast on lanes
    # o_ref: (G, NS, Cin, MM*T2)
    x = x_ref[...]
    G, NS, _, Cin, Tp = x.shape
    T1 = Tp - K + 1
    T2 = T1 - K + 1

    # ---- AvgPool2d((1, AVG)): plain VPU adds over the leading pool axis ----
    xp = x[:, :, 0]
    for a in range(1, AVG):
        xp = xp + x[:, :, a]
    xp = xp * (1.0 / AVG)                                    # (G, NS, Cin, Tp)

    # ---- stratified_layerNorm #1: per group, per channel over (NS, time) ----
    # Two-pass (mean, then centered sum of squares), unbiased (n-1) variance,
    # eps added to the std; reciprocal computed on the tiny per-channel vector,
    # then a single VPU multiply over the big array.
    n1 = NS * Tp
    mu1 = jnp.sum(xp, axis=(1, 3), keepdims=True) * (1.0 / n1)       # (G,1,Cin,1)
    xc = xp - mu1
    var1 = jnp.sum(xc * xc, axis=(1, 3), keepdims=True) * (1.0 / (n1 - 1))
    inv1 = 1.0 / (jnp.sqrt(var1) + LN_EPS)                            # tiny
    xn = xc * inv1                                            # (G, NS, Cin, Tp)

    # ---- timeConv1: Conv2d(Cin, Cin*MULT, (1,K), groups=Cin) + ReLU ----
    # Depthwise FIR.  Tap index k is the OUTER loop: each shifted slice is
    # built once, used for both mi, then dropped.  Weights/biases are read
    # from the packed ref per use (no full-tensor materialization).
    acc1 = [None] * MULT
    for k in range(K):
        xk = xn[:, :, :, k:k + T1]                            # (G, NS, Cin, T1)
        for mi in range(MULT):
            term = xk * p_ref[R_W1 + mi * K + k]              # (Cin,T1) bcast over G,NS
            if k == 0:
                acc1[mi] = term + p_ref[R_B1 + mi]
            else:
                acc1[mi] = acc1[mi] + term
    y1 = [jnp.maximum(a, 0.0) for a in acc1]                  # (G, NS, Cin, T1)

    # ---- timeConv2: Conv2d(Cin*M, Cin*M*M, (1,K), groups=Cin*M) + ReLU ----
    slabs = [None] * MM      # idx = mi*MULT + mj  <->  PyTorch out channel c*MM + mi*MULT + mj
    for mi in range(MULT):
        for k in range(K):
            yk = y1[mi][:, :, :, k:k + T2]                    # (G, NS, Cin, T2)
            for mj in range(MULT):
                idx = mi * MULT + mj
                term = yk * p_ref[R_W2 + idx * K + k, :, :T2]
                if k == 0:
                    slabs[idx] = term + p_ref[R_B2 + idx, :, :T2]
                else:
                    slabs[idx] = slabs[idx] + term
    slabs = [jnp.maximum(s, 0.0) for s in slabs]              # (G, NS, Cin, T2)

    # ---- stratified_layerNorm #2 (per output channel), two-pass ----
    n2 = NS * T2
    normed = []
    for s in slabs:
        mu = jnp.sum(s, axis=(1, 3), keepdims=True) * (1.0 / n2)
        c = s - mu
        var = jnp.sum(c * c, axis=(1, 3), keepdims=True) * (1.0 / (n2 - 1))
        normed.append(c * (1.0 / (jnp.sqrt(var) + LN_EPS)))

    # ---- F.normalize(dim=1): reciprocal-multiply, single store ----
    full = jnp.concatenate(normed, axis=-1)                   # (G, NS, Cin, MM*T2)
    ssq = jnp.sum(full * full, axis=(2, 3), keepdims=True)    # (G, NS, 1, 1)
    inv = 1.0 / jnp.maximum(jnp.sqrt(ssq), L2_EPS)
    o_ref[...] = (full * inv).astype(o_ref.dtype)


def clisa_proj(x, w1, b1, w2, b2):
    """x: (B, C, out_dim, T); conv params in PyTorch OIHW layout."""
    B, C, D, T = x.shape
    Cin = C * D                      # == n_dim_in of the PyTorch module
    assert B % 2 == 0, "stratified_layerNorm uses n_samples = B // 2; B must be even"
    NS = B // 2                      # samples per normalization group
    G = B // NS                      # number of normalization groups (== 2)
    Tp = T // AVG
    T1 = Tp - K + 1
    T2 = T1 - K + 1

    # glue: time on lanes, pool window as a leading axis, group axis leading.
    # TODO(synk): at realistic sizes, fold the avg-pool relayout into the kernel
    # (strided lane reads) to avoid re-materializing the input in HBM.
    xr = (x.reshape(B, Cin, T)[:, :, :AVG * Tp]
            .reshape(G, NS, Cin, Tp, AVG)
            .transpose(0, 1, 4, 2, 3)
            .astype(jnp.float32))                              # (G, NS, AVG, Cin, Tp)

    # glue: pack ALL conv params into one (R_TOT, Cin, T1) operand,
    # pre-broadcast along the lane (time) axis -> one DMA, plain vmuls in-kernel.
    w1_r = w1.reshape(Cin, MULT, K).transpose(1, 2, 0).reshape(MULT * K, Cin)
    b1_r = b1.reshape(Cin, MULT).transpose(1, 0)                         # (MULT, Cin)
    w2_r = w2.reshape(Cin, MULT, MULT, K).transpose(1, 2, 3, 0).reshape(MM * K, Cin)
    b2_r = b2.reshape(Cin, MULT, MULT).transpose(1, 2, 0).reshape(MM, Cin)
    params = jnp.concatenate([w1_r, b1_r, w2_r, b2_r], axis=0).astype(jnp.float32)
    assert params.shape[0] == R_TOT
    params = jnp.broadcast_to(params[:, :, None], (R_TOT, Cin, T1))

    out = pl.pallas_call(
        _clisa_proj_kernel,
        out_shape=jax.ShapeDtypeStruct((G, NS, Cin, MM * T2), jnp.float32),
        grid=(1,),   # grid folded: both normalization groups in one invocation
        in_specs=[
            pl.BlockSpec((G, NS, AVG, Cin, Tp), lambda i: (0, 0, 0, 0, 0)),
            pl.BlockSpec((R_TOT, Cin, T1), lambda i: (0, 0, 0)),
        ],
        out_specs=pl.BlockSpec((G, NS, Cin, MM * T2), lambda i: (0, 0, 0, 0)),
        compiler_params=pltpu.CompilerParams(dimension_semantics=("arbitrary",)),
    )(xr, params)

    # (G, NS, Cin, MM*T2) -> (B, Cin*MM*T2): contiguous dim merges, free bitcast.
    return out.reshape(B, Cin * MM * T2)


# ------------------------ pure-JAX reference (for checking) ------------------------
def _strat_ln_ref(o, n_samples):
    B = o.shape[0]
    G = B // n_samples
    og = o.reshape(G, n_samples, *o.shape[1:])            # (G, NS, C, H, T)
    mean = og.mean(axis=(1, 3, 4), keepdims=True)
    var = og.var(axis=(1, 3, 4), keepdims=True, ddof=1)
    og = (og - mean) / (jnp.sqrt(var) + LN_EPS)
    return og.reshape(o.shape)


def clisa_proj_reference(x, w1, b1, w2, b2):
    B, C, D, T = x.shape
    Cin = C * D
    out = x.reshape(B, Cin, 1, T)
    Tp = T // AVG
    out = out[..., :AVG * Tp].reshape(B, Cin, 1, Tp, AVG).mean(-1)
    out = _strat_ln_ref(out, B // 2)
    out = jax.nn.relu(
        jax.lax.conv_general_dilated(out, w1, (1, 1), "VALID",
                                     feature_group_count=Cin,
                                     precision=jax.lax.Precision.HIGHEST)
        + b1[None, :, None, None])
    out = jax.nn.relu(
        jax.lax.conv_general_dilated(out, w2, (1, 1), "VALID",
                                     feature_group_count=Cin * MULT,
                                     precision=jax.lax.Precision.HIGHEST)
        + b2[None, :, None, None])
    out = _strat_ln_ref(out, B // 2)
    out = out.reshape(B, -1)
    nrm = jnp.maximum(jnp.linalg.norm(out, axis=1, keepdims=True), L2_EPS)
    return out / nrm


if __name__ == "__main__":
    key = jax.random.PRNGKey(0)
    B, C, D, T = 2, 4, 4, 64          # x: (B, C, out_dim, T); n_dim_in = C*out_dim = 16
    Cin = C * D
    kx, kw1, kb1, kw2, kb2 = jax.random.split(key, 5)
    x = jax.random.normal(kx, (B, C, D, T), jnp.float32)

    # deterministic PyTorch-Conv2d-style init: U(-1/sqrt(fan_in), +), fan_in = 1*1*K
    bound = 1.0 / (K ** 0.5)
    w1 = jax.random.uniform(kw1, (Cin * MULT, 1, 1, K), jnp.float32, -bound, bound)
    b1 = jax.random.uniform(kb1, (Cin * MULT,), jnp.float32, -bound, bound)
    w2 = jax.random.uniform(kw2, (Cin * MULT * MULT, 1, 1, K), jnp.float32, -bound, bound)
    b2 = jax.random.uniform(kb2, (Cin * MULT * MULT,), jnp.float32, -bound, bound)

    out = clisa_proj(x, w1, b1, w2, b2)
    jax.block_until_ready(out)

    ref = clisa_proj_reference(x, w1, b1, w2, b2)
    T2 = (T // AVG) - 2 * (K - 1)
    assert out.shape == ref.shape == (B, Cin * MM * T2)
    err = float(jnp.max(jnp.abs(out - ref)))
    assert jnp.allclose(out, ref, atol=1e-4, rtol=1e-3), err
    print("KERNEL_OK")
</pallas_src>

<mosaic_0001>
module attributes {stable_mosaic.version = 11 : i64} {
  func.func @_clisa_proj_kernel(%arg0: i32, %arg1: memref<2x1x3x16x21xf32, #tpu.memory_space<vmem>>, %arg2: memref<42x16x16xf32, #tpu.memory_space<vmem>>, %arg3: memref<2x1x16x44xf32, #tpu.memory_space<vmem>>) attributes {dimension_semantics = [#tpu.dimension_semantics<arbitrary>], iteration_bounds = array<i64: 1>, scalar_prefetch = 0 : i64, scratch_operands = 0 : i64, tpu.core_type = #tpu.core_type<tc>, window_params = [{pipeline_mode = #tpu.pipeline_mode<synchronous>, transform_indices = @transform_0, window_bounds = array<i64: 2, 1, 3, 16, 21>}, {pipeline_mode = #tpu.pipeline_mode<synchronous>, transform_indices = @transform_1, window_bounds = array<i64: 42, 16, 16>}, {pipeline_mode = #tpu.pipeline_mode<synchronous>, transform_indices = @transform_2, window_bounds = array<i64: 2, 1, 16, 44>}]} {
    %c0 = arith.constant 0 : index
    %c0_0 = arith.constant 0 : index
    %c0_1 = arith.constant 0 : index
    %c0_2 = arith.constant 0 : index
    %c0_3 = arith.constant 0 : index
    %0 = vector.load %arg1[%c0, %c0_0, %c0_1, %c0_2, %c0_3] : memref<2x1x3x16x21xf32, #tpu.memory_space<vmem>>, vector<2x1x3x16x21xf32>
    %1 = vector.extract_strided_slice %0 {offsets = [0, 0, 0, 0, 0], sizes = [2, 1, 1, 16, 21], strides = [1, 1, 1, 1, 1]} : vector<2x1x3x16x21xf32> to vector<2x1x1x16x21xf32>
    %2 = vector.shape_cast %1 : vector<2x1x1x16x21xf32> to vector<2x1x16x21xf32>
    %3 = vector.extract_strided_slice %0 {offsets = [0, 0, 1, 0, 0], sizes = [2, 1, 1, 16, 21], strides = [1, 1, 1, 1, 1]} : vector<2x1x3x16x21xf32> to vector<2x1x1x16x21xf32>
    %4 = vector.shape_cast %3 : vector<2x1x1x16x21xf32> to vector<2x1x16x21xf32>
    %5 = arith.addf %2, %4 : vector<2x1x16x21xf32>
    %6 = vector.extract_strided_slice %0 {offsets = [0, 0, 2, 0, 0], sizes = [2, 1, 1, 16, 21], strides = [1, 1, 1, 1, 1]} : vector<2x1x3x16x21xf32> to vector<2x1x1x16x21xf32>
    %7 = vector.shape_cast %6 : vector<2x1x1x16x21xf32> to vector<2x1x16x21xf32>
    %8 = arith.addf %5, %7 : vector<2x1x16x21xf32>
    %cst = arith.constant 0.333333343 : f32
    %9 = vector.broadcast %cst : f32 to vector<2x1x16x21xf32>
    %10 = arith.mulf %8, %9 : vector<2x1x16x21xf32>
    %cst_4 = arith.constant dense<0.000000e+00> : vector<2x16xf32>
    %11 = vector.multi_reduction <add>, %10, %cst_4 [1, 3] : vector<2x1x16x21xf32> to vector<2x16xf32>
    %12 = vector.shape_cast %11 : vector<2x16xf32> to vector<2x1x16x1xf32>
    %cst_5 = arith.constant 0.0476190485 : f32
    %13 = vector.broadcast %cst_5 : f32 to vector<2x1x16x1xf32>
    %14 = arith.mulf %12, %13 : vector<2x1x16x1xf32>
    %15 = vector.broadcast %14 : vector<2x1x16x1xf32> to vector<2x1x16x21xf32>
    %16 = arith.subf %10, %15 : vector<2x1x16x21xf32>
    %17 = arith.mulf %16, %16 : vector<2x1x16x21xf32>
    %cst_6 = arith.constant dense<0.000000e+00> : vector<2x16xf32>
    %18 = vector.multi_reduction <add>, %17, %cst_6 [1, 3] : vector<2x1x16x21xf32> to vector<2x16xf32>
    %19 = vector.shape_cast %18 : vector<2x16xf32> to vector<2x1x16x1xf32>
    %cst_7 = arith.constant 5.000000e-02 : f32
    %20 = vector.broadcast %cst_7 : f32 to vector<2x1x16x1xf32>
    %21 = arith.mulf %19, %20 : vector<2x1x16x1xf32>
    %22 = math.sqrt %21 : vector<2x1x16x1xf32>
    %cst_8 = arith.constant 1.000000e-03 : f32
    %23 = vector.broadcast %cst_8 : f32 to vector<2x1x16x1xf32>
    %24 = arith.addf %22, %23 : vector<2x1x16x1xf32>
    %cst_9 = arith.constant 1.000000e+00 : f32
    %25 = vector.broadcast %cst_9 : f32 to vector<2x1x16x1xf32>
    %26 = arith.divf %25, %24 : vector<2x1x16x1xf32>
    %27 = vector.broadcast %26 : vector<2x1x16x1xf32> to vector<2x1x16x21xf32>
    %28 = arith.mulf %16, %27 : vector<2x1x16x21xf32>
    %29 = vector.extract_strided_slice %28 {offsets = [0, 0, 0, 0], sizes = [2, 1, 16, 16], strides = [1, 1, 1, 1]} : vector<2x1x16x21xf32> to vector<2x1x16x16xf32>
    %c0_10 = arith.constant 0 : index
    %c0_11 = arith.constant 0 : index
    %c0_12 = arith.constant 0 : index
    %30 = vector.load %arg2[%c0_10, %c0_11, %c0_12] : memref<42x16x16xf32, #tpu.memory_space<vmem>>, vector<1x16x16xf32>
    %31 = vector.shape_cast %30 : vector<1x16x16xf32> to vector<16x16xf32>
    %32 = vector.shape_cast %31 : vector<16x16xf32> to vector<1x1x16x16xf32>
    %33 = vector.broadcast %32 : vector<1x1x16x16xf32> to vector<2x1x16x16xf32>
    %34 = arith.mulf %29, %33 : vector<2x1x16x16xf32>
    %c12 = arith.constant 12 : index
    %c0_13 = arith.constant 0 : index
    %c0_14 = arith.constant 0 : index
    %35 = vector.load %arg2[%c12, %c0_13, %c0_14] : memref<42x16x16xf32, #tpu.memory_space<vmem>>, vector<1x16x16xf32>
    %36 = vector.shape_cast %35 : vector<1x16x16xf32> to vector<16x16xf32>
    %37 = vector.shape_cast %36 : vector<16x16xf32> to vector<1x1x16x16xf32>
    %38 = vector.broadcast %37 : vector<1x1x16x16xf32> to vector<2x1x16x16xf32>
    %39 = arith.addf %34, %38 : vector<2x1x16x16xf32>
    %c6 = arith.constant 6 : index
    %c0_15 = arith.constant 0 : index
    %c0_16 = arith.constant 0 : index
    %40 = vector.load %arg2[%c6, %c0_15, %c0_16] : memref<42x16x16xf32, #tpu.memory_space<vmem>>, vector<1x16x16xf32>
    %41 = vector.shape_cast %40 : vector<1x16x16xf32> to vector<16x16xf32>
    %42 = vector.shape_cast %41 : vector<16x16xf32> to vector<1x1x16x16xf32>
    %43 = vector.broadcast %42 : vector<1x1x16x16xf32> to vector<2x1x16x16xf32>
    %44 = arith.mulf %29, %43 : vector<2x1x16x16xf32>
    %c13 = arith.constant 13 : index
    %c0_17 = arith.constant 0 : index
    %c0_18 = arith.constant 0 : index
    %45 = vector.load %arg2[%c13, %c0_17, %c0_18] : memref<42x16x16xf32, #tpu.memory_space<vmem>>, vector<1x16x16xf32>
    %46 = vector.shape_cast %45 : vector<1x16x16xf32> to vector<16x16xf32>
    %47 = vector.shape_cast %46 : vector<16x16xf32> to vector<1x1x16x16xf32>
    %48 = vector.broadcast %47 : vector<1x1x16x16xf32> to vector<2x1x16x16xf32>
    %49 = arith.addf %44, %48 : vector<2x1x16x16xf32>
    %50 = vector.extract_strided_slice %28 {offsets = [0, 0, 0, 1], sizes = [2, 1, 16, 16], strides = [1, 1, 1, 1]} : vector<2x1x16x21xf32> to vector<2x1x16x16xf32>
    %c1 = arith.constant 1 : index
    %c0_19 = arith.constant 0 : index
    %c0_20 = arith.constant 0 : index
    %51 = vector.load %arg2[%c1, %c0_19, %c0_20] : memref<42x16x16xf32, #tpu.memory_space<vmem>>, vector<1x16x16xf32>
    %52 = vector.shape_cast %51 : vector<1x16x16xf32> to vector<16x16xf32>
    %53 = vector.shape_cast %52 : vector<16x16xf32> to vector<1x1x16x16xf32>
    %54 = vector.broadcast %53 : vector<1x1x16x16xf32> to vector<2x1x16x16xf32>
    %55 = arith.mulf %50, %54 : vector<2x1x16x16xf32>
    %56 = arith.addf %39, %55 : vector<2x1x16x16xf32>
    %c7 = arith.constant 7 : index
    %c0_21 = arith.constant 0 : index
    %c0_22 = arith.constant 0 : index
    %57 = vector.load %arg2[%c7, %c0_21, %c0_22] : memref<42x16x16xf32, #tpu.memory_space<vmem>>, vector<1x16x16xf32>
    %58 = vector.shape_cast %57 : vector<1x16x16xf32> to vector<16x16xf32>
    %59 = vector.shape_cast %58 : vector<16x16xf32> to vector<1x1x16x16xf32>
    %60 = vector.broadcast %59 : vector<1x1x16x16xf32> to vector<2x1x16x16xf32>
    %61 = arith.mulf %50, %60 : vector<2x1x16x16xf32>
    %62 = arith.addf %49, %61 : vector<2x1x16x16xf32>
    %63 = vector.extract_strided_slice %28 {offsets = [0, 0, 0, 2], sizes = [2, 1, 16, 16], strides = [1, 1, 1, 1]} : vector<2x1x16x21xf32> to vector<2x1x16x16xf32>
    %c2 = arith.constant 2 : index
    %c0_23 = arith.constant 0 : index
    %c0_24 = arith.constant 0 : index
    %64 = vector.load %arg2[%c2, %c0_23, %c0_24] : memref<42x16x16xf32, #tpu.memory_space<vmem>>, vector<1x16x16xf32>
    %65 = vector.shape_cast %64 : vector<1x16x16xf32> to vector<16x16xf32>
    %66 = vector.shape_cast %65 : vector<16x16xf32> to vector<1x1x16x16xf32>
    %67 = vector.broadcast %66 : vector<1x1x16x16xf32> to vector<2x1x16x16xf32>
    %68 = arith.mulf %63, %67 : vector<2x1x16x16xf32>
    %69 = arith.addf %56, %68 : vector<2x1x16x16xf32>
    %c8 = arith.constant 8 : index
    %c0_25 = arith.constant 0 : index
    %c0_26 = arith.constant 0 : index
    %70 = vector.load %arg2[%c8, %c0_25, %c0_26] : memref<42x16x16xf32, #tpu.memory_space<vmem>>, vector<1x16x16xf32>
    %71 = vector.shape_cast %70 : vector<1x16x16xf32> to vector<16x16xf32>
    %72 = vector.shape_cast %71 : vector<16x16xf32> to vector<1x1x16x16xf32>
    %73 = vector.broadcast %72 : vector<1x1x16x16xf32> to vector<2x1x16x16xf32>
    %74 = arith.mulf %63, %73 : vector<2x1x16x16xf32>
    %75 = arith.addf %62, %74 : vector<2x1x16x16xf32>
    %76 = vector.extract_strided_slice %28 {offsets = [0, 0, 0, 3], sizes = [2, 1, 16, 16], strides = [1, 1, 1, 1]} : vector<2x1x16x21xf32> to vector<2x1x16x16xf32>
    %c3 = arith.constant 3 : index
    %c0_27 = arith.constant 0 : index
    %c0_28 = arith.constant 0 : index
    %77 = vector.load %arg2[%c3, %c0_27, %c0_28] : memref<42x16x16xf32, #tpu.memory_space<vmem>>, vector<1x16x16xf32>
    %78 = vector.shape_cast %77 : vector<1x16x16xf32> to vector<16x16xf32>
    %79 = vector.shape_cast %78 : vector<16x16xf32> to vector<1x1x16x16xf32>
    %80 = vector.broadcast %79 : vector<1x1x16x16xf32> to vector<2x1x16x16xf32>
    %81 = arith.mulf %76, %80 : vector<2x1x16x16xf32>
    %82 = arith.addf %69, %81 : vector<2x1x16x16xf32>
    %c9 = arith.constant 9 : index
    %c0_29 = arith.constant 0 : index
    %c0_30 = arith.constant 0 : index
    %83 = vector.load %arg2[%c9, %c0_29, %c0_30] : memref<42x16x16xf32, #tpu.memory_space<vmem>>, vector<1x16x16xf32>
    %84 = vector.shape_cast %83 : vector<1x16x16xf32> to vector<16x16xf32>
    %85 = vector.shape_cast %84 : vector<16x16xf32> to vector<1x1x16x16xf32>
    %86 = vector.broadcast %85 : vector<1x1x16x16xf32> to vector<2x1x16x16xf32>
    %87 = arith.mulf %76, %86 : vector<2x1x16x16xf32>
    %88 = arith.addf %75, %87 : vector<2x1x16x16xf32>
    %89 = vector.extract_strided_slice %28 {offsets = [0, 0, 0, 4], sizes = [2, 1, 16, 16], strides = [1, 1, 1, 1]} : vector<2x1x16x21xf32> to vector<2x1x16x16xf32>
    %c4 = arith.constant 4 : index
    %c0_31 = arith.constant 0 : index
    %c0_32 = arith.constant 0 : index
    %90 = vector.load %arg2[%c4, %c0_31, %c0_32] : memref<42x16x16xf32, #tpu.memory_space<vmem>>, vector<1x16x16xf32>
    %91 = vector.shape_cast %90 : vector<1x16x16xf32> to vector<16x16xf32>
    %92 = vector.shape_cast %91 : vector<16x16xf32> to vector<1x1x16x16xf32>
    %93 = vector.broadcast %92 : vector<1x1x16x16xf32> to vector<2x1x16x16xf32>
    %94 = arith.mulf %89, %93 : vector<2x1x16x16xf32>
    %95 = arith.addf %82, %94 : vector<2x1x16x16xf32>
    %c10 = arith.constant 10 : index
    %c0_33 = arith.constant 0 : index
    %c0_34 = arith.constant 0 : index
    %96 = vector.load %arg2[%c10, %c0_33, %c0_34] : memref<42x16x16xf32, #tpu.memory_space<vmem>>, vector<1x16x16xf32>
    %97 = vector.shape_cast %96 : vector<1x16x16xf32> to vector<16x16xf32>
    %98 = vector.shape_cast %97 : vector<16x16xf32> to vector<1x1x16x16xf32>
    %99 = vector.broadcast %98 : vector<1x1x16x16xf32> to vector<2x1x16x16xf32>
    %100 = arith.mulf %89, %99 : vector<2x1x16x16xf32>
    %101 = arith.addf %88, %100 : vector<2x1x16x16xf32>
    %102 = vector.extract_strided_slice %28 {offsets = [0, 0, 0, 5], sizes = [2, 1, 16, 16], strides = [1, 1, 1, 1]} : vector<2x1x16x21xf32> to vector<2x1x16x16xf32>
    %c5 = arith.constant 5 : index
    %c0_35 = arith.constant 0 : index
    %c0_36 = arith.constant 0 : index
    %103 = vector.load %arg2[%c5, %c0_35, %c0_36] : memref<42x16x16xf32, #tpu.memory_space<vmem>>, vector<1x16x16xf32>
    %104 = vector.shape_cast %103 : vector<1x16x16xf32> to vector<16x16xf32>
    %105 = vector.shape_cast %104 : vector<16x16xf32> to vector<1x1x16x16xf32>
    %106 = vector.broadcast %105 : vector<1x1x16x16xf32> to vector<2x1x16x16xf32>
    %107 = arith.mulf %102, %106 : vector<2x1x16x16xf32>
    %108 = arith.addf %95, %107 : vector<2x1x16x16xf32>
    %c11 = arith.constant 11 : index
    %c0_37 = arith.constant 0 : index
    %c0_38 = arith.constant 0 : index
    %109 = vector.load %arg2[%c11, %c0_37, %c0_38] : memref<42x16x16xf32, #tpu.memory_space<vmem>>, vector<1x16x16xf32>
    %110 = vector.shape_cast %109 : vector<1x16x16xf32> to vector<16x16xf32>
    %111 = vector.shape_cast %110 : vector<16x16xf32> to vector<1x1x16x16xf32>
    %112 = vector.broadcast %111 : vector<1x1x16x16xf32> to vector<2x1x16x16xf32>
    %113 = arith.mulf %102, %112 : vector<2x1x16x16xf32>
    %114 = arith.addf %101, %113 : vector<2x1x16x16xf32>
    %cst_39 = arith.constant 0.000000e+00 : f32
    %115 = vector.broadcast %cst_39 : f32 to vector<2x1x16x16xf32>
    %116 = arith.maximumf %108, %115 : vector<2x1x16x16xf32>
    %cst_40 = arith.constant 0.000000e+00 : f32
    %117 = vector.broadcast %cst_40 : f32 to vector<2x1x16x16xf32>
    %118 = arith.maximumf %114, %117 : vector<2x1x16x16xf32>
    %119 = vector.extract_strided_slice %116 {offsets = [0, 0, 0, 0], sizes = [2, 1, 16, 11], strides = [1, 1, 1, 1]} : vector<2x1x16x16xf32> to vector<2x1x16x11xf32>
    %c14 = arith.constant 14 : index
    %c0_41 = arith.constant 0 : index
    %c0_42 = arith.constant 0 : index
    %120 = vector.load %arg2[%c14, %c0_41, %c0_42] : memref<42x16x16xf32, #tpu.memory_space<vmem>>, vector<1x16x11xf32>
    %121 = vector.shape_cast %120 : vector<1x16x11xf32> to vector<16x11xf32>
    %122 = vector.shape_cast %121 : vector<16x11xf32> to vector<1x1x16x11xf32>
    %123 = vector.broadcast %122 : vector<1x1x16x11xf32> to vector<2x1x16x11xf32>
    %124 = arith.mulf %119, %123 : vector<2x1x16x11xf32>
    %c38 = arith.constant 38 : index
    %c0_43 = arith.constant 0 : index
    %c0_44 = arith.constant 0 : index
    %125 = vector.load %arg2[%c38, %c0_43, %c0_44] : memref<42x16x16xf32, #tpu.memory_space<vmem>>, vector<1x16x11xf32>
    %126 = vector.shape_cast %125 : vector<1x16x11xf32> to vector<16x11xf32>
    %127 = vector.shape_cast %126 : vector<16x11xf32> to vector<1x1x16x11xf32>
    %128 = vector.broadcast %127 : vector<1x1x16x11xf32> to vector<2x1x16x11xf32>
    %129 = arith.addf %124, %128 : vector<2x1x16x11xf32>
    %c20 = arith.constant 20 : index
    %c0_45 = arith.constant 0 : index
    %c0_46 = arith.constant 0 : index
    %130 = vector.load %arg2[%c20, %c0_45, %c0_46] : memref<42x16x16xf32, #tpu.memory_space<vmem>>, vector<1x16x11xf32>
    %131 = vector.shape_cast %130 : vector<1x16x11xf32> to vector<16x11xf32>
    %132 = vector.shape_cast %131 : vector<16x11xf32> to vector<1x1x16x11xf32>
    %133 = vector.broadcast %132 : vector<1x1x16x11xf32> to vector<2x1x16x11xf32>
    %134 = arith.mulf %119, %133 : vector<2x1x16x11xf32>
    %c39 = arith.constant 39 : index
    %c0_47 = arith.constant 0 : index
    %c0_48 = arith.constant 0 : index
    %135 = vector.load %arg2[%c39, %c0_47, %c0_48] : memref<42x16x16xf32, #tpu.memory_space<vmem>>, vector<1x16x11xf32>
    %136 = vector.shape_cast %135 : vector<1x16x11xf32> to vector<16x11xf32>
    %137 = vector.shape_cast %136 : vector<16x11xf32> to vector<1x1x16x11xf32>
    %138 = vector.broadcast %137 : vector<1x1x16x11xf32> to vector<2x1x16x11xf32>
    %139 = arith.addf %134, %138 : vector<2x1x16x11xf32>
    %140 = vector.extract_strided_slice %116 {offsets = [0, 0, 0, 1], sizes = [2, 1, 16, 11], strides = [1, 1, 1, 1]} : vector<2x1x16x16xf32> to vector<2x1x16x11xf32>
    %c15 = arith.constant 15 : index
    %c0_49 = arith.constant 0 : index
    %c0_50 = arith.constant 0 : index
    %141 = vector.load %arg2[%c15, %c0_49, %c0_50] : memref<42x16x16xf32, #tpu.memory_space<vmem>>, vector<1x16x11xf32>
    %142 = vector.shape_cast %141 : vector<1x16x11xf32> to vector<16x11xf32>
    %143 = vector.shape_cast %142 : vector<16x11xf32> to vector<1x1x16x11xf32>
    %144 = vector.broadcast %143 : vector<1x1x16x11xf32> to vector<2x1x16x11xf32>
    %145 = arith.mulf %140, %144 : vector<2x1x16x11xf32>
    %146 = arith.addf %129, %145 : vector<2x1x16x11xf32>
    %c21 = arith.constant 21 : index
    %c0_51 = arith.constant 0 : index
    %c0_52 = arith.constant 0 : index
    %147 = vector.load %arg2[%c21, %c0_51, %c0_52] : memref<42x16x16xf32, #tpu.memory_space<vmem>>, vector<1x16x11xf32>
    %148 = vector.shape_cast %147 : vector<1x16x11xf32> to vector<16x11xf32>
    %149 = vector.shape_cast %148 : vector<16x11xf32> to vector<1x1x16x11xf32>
    %150 = vector.broadcast %149 : vector<1x1x16x11xf32> to vector<2x1x16x11xf32>
    %151 = arith.mulf %140, %150 : vector<2x1x16x11xf32>
    %152 = arith.addf %139, %151 : vector<2x1x16x11xf32>
    %153 = vector.extract_strided_slice %116 {offsets = [0, 0, 0, 2], sizes = [2, 1, 16, 11], strides = [1, 1, 1, 1]} : vector<2x1x16x16xf32> to vector<2x1x16x11xf32>
    %c16 = arith.constant 16 : index
    %c0_53 = arith.constant 0 : index
    %c0_54 = arith.constant 0 : index
    %154 = vector.load %arg2[%c16, %c0_53, %c0_54] : memref<42x16x16xf32, #tpu.memory_space<vmem>>, vector<1x16x11xf32>
    %155 = vector.shape_cast %154 : vector<1x16x11xf32> to vector<16x11xf32>
    %156 = vector.shape_cast %155 : vector<16x11xf32> to vector<1x1x16x11xf32>
    %157 = vector.broadcast %156 : vector<1x1x16x11xf32> to vector<2x1x16x11xf32>
    %158 = arith.mulf %153, %157 : vector<2x1x16x11xf32>
    %159 = arith.addf %146, %158 : vector<2x1x16x11xf32>
    %c22 = arith.constant 22 : index
    %c0_55 = arith.constant 0 : index
    %c0_56 = arith.constant 0 : index
    %160 = vector.load %arg2[%c22, %c0_55, %c0_56] : memref<42x16x16xf32, #tpu.memory_space<vmem>>, vector<1x16x11xf32>
    %161 = vector.shape_cast %160 : vector<1x16x11xf32> to vector<16x11xf32>
    %162 = vector.shape_cast %161 : vector<16x11xf32> to vector<1x1x16x11xf32>
    %163 = vector.broadcast %162 : vector<1x1x16x11xf32> to vector<2x1x16x11xf32>
    %164 = arith.mulf %153, %163 : vector<2x1x16x11xf32>
    %165 = arith.addf %152, %164 : vector<2x1x16x11xf32>
    %166 = vector.extract_strided_slice %116 {offsets = [0, 0, 0, 3], sizes = [2, 1, 16, 11], strides = [1, 1, 1, 1]} : vector<2x1x16x16xf32> to vector<2x1x16x11xf32>
    %c17 = arith.constant 17 : index
    %c0_57 = arith.constant 0 : index
    %c0_58 = arith.constant 0 : index
    %167 = vector.load %arg2[%c17, %c0_57, %c0_58] : memref<42x16x16xf32, #tpu.memory_space<vmem>>, vector<1x16x11xf32>
    %168 = vector.shape_cast %167 : vector<1x16x11xf32> to vector<16x11xf32>
    %169 = vector.shape_cast %168 : vector<16x11xf32> to vector<1x1x16x11xf32>
    %170 = vector.broadcast %169 : vector<1x1x16x11xf32> to vector<2x1x16x11xf32>
    %171 = arith.mulf %166, %170 : vector<2x1x16x11xf32>
    %172 = arith.addf %159, %171 : vector<2x1x16x11xf32>
    %c23 = arith.constant 23 : index
    %c0_59 = arith.constant 0 : index
    %c0_60 = arith.constant 0 : index
    %173 = vector.load %arg2[%c23, %c0_59, %c0_60] : memref<42x16x16xf32, #tpu.memory_space<vmem>>, vector<1x16x11xf32>
    %174 = vector.shape_cast %173 : vector<1x16x11xf32> to vector<16x11xf32>
    %175 = vector.shape_cast %174 : vector<16x11xf32> to vector<1x1x16x11xf32>
    %176 = vector.broadcast %175 : vector<1x1x16x11xf32> to vector<2x1x16x11xf32>
    %177 = arith.mulf %166, %176 : vector<2x1x16x11xf32>
    %178 = arith.addf %165, %177 : vector<2x1x16x11xf32>
    %179 = vector.extract_strided_slice %116 {offsets = [0, 0, 0, 4], sizes = [2, 1, 16, 11], strides = [1, 1, 1, 1]} : vector<2x1x16x16xf32> to vector<2x1x16x11xf32>
    %c18 = arith.constant 18 : index
    %c0_61 = arith.constant 0 : index
    %c0_62 = arith.constant 0 : index
    %180 = vector.load %arg2[%c18, %c0_61, %c0_62] : memref<42x16x16xf32, #tpu.memory_space<vmem>>, vector<1x16x11xf32>
    %181 = vector.shape_cast %180 : vector<1x16x11xf32> to vector<16x11xf32>
    %182 = vector.shape_cast %181 : vector<16x11xf32> to vector<1x1x16x11xf32>
    %183 = vector.broadcast %182 : vector<1x1x16x11xf32> to vector<2x1x16x11xf32>
    %184 = arith.mulf %179, %183 : vector<2x1x16x11xf32>
    %185 = arith.addf %172, %184 : vector<2x1x16x11xf32>
    %c24 = arith.constant 24 : index
    %c0_63 = arith.constant 0 : index
    %c0_64 = arith.constant 0 : index
    %186 = vector.load %arg2[%c24, %c0_63, %c0_64] : memref<42x16x16xf32, #tpu.memory_space<vmem>>, vector<1x16x11xf32>
    %187 = vector.shape_cast %186 : vector<1x16x11xf32> to vector<16x11xf32>
    %188 = vector.shape_cast %187 : vector<16x11xf32> to vector<1x1x16x11xf32>
    %189 = vector.broadcast %188 : vector<1x1x16x11xf32> to vector<2x1x16x11xf32>
    %190 = arith.mulf %179, %189 : vector<2x1x16x11xf32>
    %191 = arith.addf %178, %190 : vector<2x1x16x11xf32>
    %192 = vector.extract_strided_slice %116 {offsets = [0, 0, 0, 5], sizes = [2, 1, 16, 11], strides = [1, 1, 1, 1]} : vector<2x1x16x16xf32> to vector<2x1x16x11xf32>
    %c19 = arith.constant 19 : index
    %c0_65 = arith.constant 0 : index
    %c0_66 = arith.constant 0 : index
    %193 = vector.load %arg2[%c19, %c0_65, %c0_66] : memref<42x16x16xf32, #tpu.memory_space<vmem>>, vector<1x16x11xf32>
    %194 = vector.shape_cast %193 : vector<1x16x11xf32> to vector<16x11xf32>
    %195 = vector.shape_cast %194 : vector<16x11xf32> to vector<1x1x16x11xf32>
    %196 = vector.broadcast %195 : vector<1x1x16x11xf32> to vector<2x1x16x11xf32>
    %197 = arith.mulf %192, %196 : vector<2x1x16x11xf32>
    %198 = arith.addf %185, %197 : vector<2x1x16x11xf32>
    %c25 = arith.constant 25 : index
    %c0_67 = arith.constant 0 : index
    %c0_68 = arith.constant 0 : index
    %199 = vector.load %arg2[%c25, %c0_67, %c0_68] : memref<42x16x16xf32, #tpu.memory_space<vmem>>, vector<1x16x11xf32>
    %200 = vector.shape_cast %199 : vector<1x16x11xf32> to vector<16x11xf32>
    %201 = vector.shape_cast %200 : vector<16x11xf32> to vector<1x1x16x11xf32>
    %202 = vector.broadcast %201 : vector<1x1x16x11xf32> to vector<2x1x16x11xf32>
    %203 = arith.mulf %192, %202 : vector<2x1x16x11xf32>
    %204 = arith.addf %191, %203 : vector<2x1x16x11xf32>
    %205 = vector.extract_strided_slice %118 {offsets = [0, 0, 0, 0], sizes = [2, 1, 16, 11], strides = [1, 1, 1, 1]} : vector<2x1x16x16xf32> to vector<2x1x16x11xf32>
    %c26 = arith.constant 26 : index
    %c0_69 = arith.constant 0 : index
    %c0_70 = arith.constant 0 : index
    %206 = vector.load %arg2[%c26, %c0_69, %c0_70] : memref<42x16x16xf32, #tpu.memory_space<vmem>>, vector<1x16x11xf32>
    %207 = vector.shape_cast %206 : vector<1x16x11xf32> to vector<16x11xf32>
    %208 = vector.shape_cast %207 : vector<16x11xf32> to vector<1x1x16x11xf32>
    %209 = vector.broadcast %208 : vector<1x1x16x11xf32> to vector<2x1x16x11xf32>
    %210 = arith.mulf %205, %209 : vector<2x1x16x11xf32>
    %c40 = arith.constant 40 : index
    %c0_71 = arith.constant 0 : index
    %c0_72 = arith.constant 0 : index
    %211 = vector.load %arg2[%c40, %c0_71, %c0_72] : memref<42x16x16xf32, #tpu.memory_space<vmem>>, vector<1x16x11xf32>
    %212 = vector.shape_cast %211 : vector<1x16x11xf32> to vector<16x11xf32>
    %213 = vector.shape_cast %212 : vector<16x11xf32> to vector<1x1x16x11xf32>
    %214 = vector.broadcast %213 : vector<1x1x16x11xf32> to vector<2x1x16x11xf32>
    %215 = arith.addf %210, %214 : vector<2x1x16x11xf32>
    %c32 = arith.constant 32 : index
    %c0_73 = arith.constant 0 : index
    %c0_74 = arith.constant 0 : index
    %216 = vector.load %arg2[%c32, %c0_73, %c0_74] : memref<42x16x16xf32, #tpu.memory_space<vmem>>, vector<1x16x11xf32>
    %217 = vector.shape_cast %216 : vector<1x16x11xf32> to vector<16x11xf32>
    %218 = vector.shape_cast %217 : vector<16x11xf32> to vector<1x1x16x11xf32>
    %219 = vector.broadcast %218 : vector<1x1x16x11xf32> to vector<2x1x16x11xf32>
    %220 = arith.mulf %205, %219 : vector<2x1x16x11xf32>
    %c41 = arith.constant 41 : index
    %c0_75 = arith.constant 0 : index
    %c0_76 = arith.constant 0 : index
    %221 = vector.load %arg2[%c41, %c0_75, %c0_76] : memref<42x16x16xf32, #tpu.memory_space<vmem>>, vector<1x16x11xf32>
    %222 = vector.shape_cast %221 : vector<1x16x11xf32> to vector<16x11xf32>
    %223 = vector.shape_cast %222 : vector<16x11xf32> to vector<1x1x16x11xf32>
    %224 = vector.broadcast %223 : vector<1x1x16x11xf32> to vector<2x1x16x11xf32>
    %225 = arith.addf %220, %224 : vector<2x1x16x11xf32>
    %226 = vector.extract_strided_slice %118 {offsets = [0, 0, 0, 1], sizes = [2, 1, 16, 11], strides = [1, 1, 1, 1]} : vector<2x1x16x16xf32> to vector<2x1x16x11xf32>
    %c27 = arith.constant 27 : index
    %c0_77 = arith.constant 0 : index
    %c0_78 = arith.constant 0 : index
    %227 = vector.load %arg2[%c27, %c0_77, %c0_78] : memref<42x16x16xf32, #tpu.memory_space<vmem>>, vector<1x16x11xf32>
    %228 = vector.shape_cast %227 : vector<1x16x11xf32> to vector<16x11xf32>
    %229 = vector.shape_cast %228 : vector<16x11xf32> to vector<1x1x16x11xf32>
    %230 = vector.broadcast %229 : vector<1x1x16x11xf32> to vector<2x1x16x11xf32>
    %231 = arith.mulf %226, %230 : vector<2x1x16x11xf32>
    %232 = arith.addf %215, %231 : vector<2x1x16x11xf32>
    %c33 = arith.constant 33 : index
    %c0_79 = arith.constant 0 : index
    %c0_80 = arith.constant 0 : index
    %233 = vector.load %arg2[%c33, %c0_79, %c0_80] : memref<42x16x16xf32, #tpu.memory_space<vmem>>, vector<1x16x11xf32>
    %234 = vector.shape_cast %233 : vector<1x16x11xf32> to vector<16x11xf32>
    %235 = vector.shape_cast %234 : vector<16x11xf32> to vector<1x1x16x11xf32>
    %236 = vector.broadcast %235 : vector<1x1x16x11xf32> to vector<2x1x16x11xf32>
    %237 = arith.mulf %226, %236 : vector<2x1x16x11xf32>
    %238 = arith.addf %225, %237 : vector<2x1x16x11xf32>
    %239 = vector.extract_strided_slice %118 {offsets = [0, 0, 0, 2], sizes = [2, 1, 16, 11], strides = [1, 1, 1, 1]} : vector<2x1x16x16xf32> to vector<2x1x16x11xf32>
    %c28 = arith.constant 28 : index
    %c0_81 = arith.constant 0 : index
    %c0_82 = arith.constant 0 : index
    %240 = vector.load %arg2[%c28, %c0_81, %c0_82] : memref<42x16x16xf32, #tpu.memory_space<vmem>>, vector<1x16x11xf32>
    %241 = vector.shape_cast %240 : vector<1x16x11xf32> to vector<16x11xf32>
    %242 = vector.shape_cast %241 : vector<16x11xf32> to vector<1x1x16x11xf32>
    %243 = vector.broadcast %242 : vector<1x1x16x11xf32> to vector<2x1x16x11xf32>
    %244 = arith.mulf %239, %243 : vector<2x1x16x11xf32>
    %245 = arith.addf %232, %244 : vector<2x1x16x11xf32>
    %c34 = arith.constant 34 : index
    %c0_83 = arith.constant 0 : index
    %c0_84 = arith.constant 0 : index
    %246 = vector.load %arg2[%c34, %c0_83, %c0_84] : memref<42x16x16xf32, #tpu.memory_space<vmem>>, vector<1x16x11xf32>
    %247 = vector.shape_cast %246 : vector<1x16x11xf32> to vector<16x11xf32>
    %248 = vector.shape_cast %247 : vector<16x11xf32> to vector<1x1x16x11xf32>
    %249 = vector.broadcast %248 : vector<1x1x16x11xf32> to vector<2x1x16x11xf32>
    %250 = arith.mulf %239, %249 : vector<2x1x16x11xf32>
    %251 = arith.addf %238, %250 : vector<2x1x16x11xf32>
    %252 = vector.extract_strided_slice %118 {offsets = [0, 0, 0, 3], sizes = [2, 1, 16, 11], strides = [1, 1, 1, 1]} : vector<2x1x16x16xf32> to vector<2x1x16x11xf32>
    %c29 = arith.constant 29 : index
    %c0_85 = arith.constant 0 : index
    %c0_86 = arith.constant 0 : index
    %253 = vector.load %arg2[%c29, %c0_85, %c0_86] : memref<42x16x16xf32, #tpu.memory_space<vmem>>, vector<1x16x11xf32>
    %254 = vector.shape_cast %253 : vector<1x16x11xf32> to vector<16x11xf32>
    %255 = vector.shape_cast %254 : vector<16x11xf32> to vector<1x1x16x11xf32>
    %256 = vector.broadcast %255 : vector<1x1x16x11xf32> to vector<2x1x16x11xf32>
    %257 = arith.mulf %252, %256 : vector<2x1x16x11xf32>
    %258 = arith.addf %245, %257 : vector<2x1x16x11xf32>
    %c35 = arith.constant 35 : index
    %c0_87 = arith.constant 0 : index
    %c0_88 = arith.constant 0 : index
    %259 = vector.load %arg2[%c35, %c0_87, %c0_88] : memref<42x16x16xf32, #tpu.memory_space<vmem>>, vector<1x16x11xf32>
    %260 = vector.shape_cast %259 : vector<1x16x11xf32> to vector<16x11xf32>
    %261 = vector.shape_cast %260 : vector<16x11xf32> to vector<1x1x16x11xf32>
    %262 = vector.broadcast %261 : vector<1x1x16x11xf32> to vector<2x1x16x11xf32>
    %263 = arith.mulf %252, %262 : vector<2x1x16x11xf32>
    %264 = arith.addf %251, %263 : vector<2x1x16x11xf32>
    %265 = vector.extract_strided_slice %118 {offsets = [0, 0, 0, 4], sizes = [2, 1, 16, 11], strides = [1, 1, 1, 1]} : vector<2x1x16x16xf32> to vector<2x1x16x11xf32>
    %c30 = arith.constant 30 : index
    %c0_89 = arith.constant 0 : index
    %c0_90 = arith.constant 0 : index
    %266 = vector.load %arg2[%c30, %c0_89, %c0_90] : memref<42x16x16xf32, #tpu.memory_space<vmem>>, vector<1x16x11xf32>
    %267 = vector.shape_cast %266 : vector<1x16x11xf32> to vector<16x11xf32>
    %268 = vector.shape_cast %267 : vector<16x11xf32> to vector<1x1x16x11xf32>
    %269 = vector.broadcast %268 : vector<1x1x16x11xf32> to vector<2x1x16x11xf32>
    %270 = arith.mulf %265, %269 : vector<2x1x16x11xf32>
    %271 = arith.addf %258, %270 : vector<2x1x16x11xf32>
    %c36 = arith.constant 36 : index
    %c0_91 = arith.constant 0 : index
    %c0_92 = arith.constant 0 : index
    %272 = vector.load %arg2[%c36, %c0_91, %c0_92] : memref<42x16x16xf32, #tpu.memory_space<vmem>>, vector<1x16x11xf32>
    %273 = vector.shape_cast %272 : vector<1x16x11xf32> to vector<16x11xf32>
    %274 = vector.shape_cast %273 : vector<16x11xf32> to vector<1x1x16x11xf32>
    %275 = vector.broadcast %274 : vector<1x1x16x11xf32> to vector<2x1x16x11xf32>
    %276 = arith.mulf %265, %275 : vector<2x1x16x11xf32>
    %277 = arith.addf %264, %276 : vector<2x1x16x11xf32>
    %278 = vector.extract_strided_slice %118 {offsets = [0, 0, 0, 5], sizes = [2, 1, 16, 11], strides = [1, 1, 1, 1]} : vector<2x1x16x16xf32> to vector<2x1x16x11xf32>
    %c31 = arith.constant 31 : index
    %c0_93 = arith.constant 0 : index
    %c0_94 = arith.constant 0 : index
    %279 = vector.load %arg2[%c31, %c0_93, %c0_94] : memref<42x16x16xf32, #tpu.memory_space<vmem>>, vector<1x16x11xf32>
    %280 = vector.shape_cast %279 : vector<1x16x11xf32> to vector<16x11xf32>
    %281 = vector.shape_cast %280 : vector<16x11xf32> to vector<1x1x16x11xf32>
    %282 = vector.broadcast %281 : vector<1x1x16x11xf32> to vector<2x1x16x11xf32>
    %283 = arith.mulf %278, %282 : vector<2x1x16x11xf32>
    %284 = arith.addf %271, %283 : vector<2x1x16x11xf32>
    %c37 = arith.constant 37 : index
    %c0_95 = arith.constant 0 : index
    %c0_96 = arith.constant 0 : index
    %285 = vector.load %arg2[%c37, %c0_95, %c0_96] : memref<42x16x16xf32, #tpu.memory_space<vmem>>, vector<1x16x11xf32>
    %286 = vector.shape_cast %285 : vector<1x16x11xf32> to vector<16x11xf32>
    %287 = vector.shape_cast %286 : vector<16x11xf32> to vector<1x1x16x11xf32>
    %288 = vector.broadcast %287 : vector<1x1x16x11xf32> to vector<2x1x16x11xf32>
    %289 = arith.mulf %278, %288 : vector<2x1x16x11xf32>
    %290 = arith.addf %277, %289 : vector<2x1x16x11xf32>
    %cst_97 = arith.constant 0.000000e+00 : f32
    %291 = vector.broadcast %cst_97 : f32 to vector<2x1x16x11xf32>
    %292 = arith.maximumf %198, %291 : vector<2x1x16x11xf32>
    %cst_98 = arith.constant 0.000000e+00 : f32
    %293 = vector.broadcast %cst_98 : f32 to vector<2x1x16x11xf32>
    %294 = arith.maximumf %204, %293 : vector<2x1x16x11xf32>
    %cst_99 = arith.constant 0.000000e+00 : f32
    %295 = vector.broadcast %cst_99 : f32 to vector<2x1x16x11xf32>
    %296 = arith.maximumf %284, %295 : vector<2x1x16x11xf32>
    %cst_100 = arith.constant 0.000000e+00 : f32
    %297 = vector.broadcast %cst_100 : f32 to vector<2x1x16x11xf32>
    %298 = arith.maximumf %290, %297 : vector<2x1x16x11xf32>
    %cst_101 = arith.constant dense<0.000000e+00> : vector<2x16xf32>
    %299 = vector.multi_reduction <add>, %292, %cst_101 [1, 3] : vector<2x1x16x11xf32> to vector<2x16xf32>
    %300 = vector.shape_cast %299 : vector<2x16xf32> to vector<2x1x16x1xf32>
    %cst_102 = arith.constant 0.0909090936 : f32
    %301 = vector.broadcast %cst_102 : f32 to vector<2x1x16x1xf32>
    %302 = arith.mulf %300, %301 : vector<2x1x16x1xf32>
    %303 = vector.broadcast %302 : vector<2x1x16x1xf32> to vector<2x1x16x11xf32>
    %304 = arith.subf %292, %303 : vector<2x1x16x11xf32>
    %305 = arith.mulf %304, %304 : vector<2x1x16x11xf32>
    %cst_103 = arith.constant dense<0.000000e+00> : vector<2x16xf32>
    %306 = vector.multi_reduction <add>, %305, %cst_103 [1, 3] : vector<2x1x16x11xf32> to vector<2x16xf32>
    %307 = vector.shape_cast %306 : vector<2x16xf32> to vector<2x1x16x1xf32>
    %cst_104 = arith.constant 1.000000e-01 : f32
    %308 = vector.broadcast %cst_104 : f32 to vector<2x1x16x1xf32>
    %309 = arith.mulf %307, %308 : vector<2x1x16x1xf32>
    %310 = math.sqrt %309 : vector<2x1x16x1xf32>
    %cst_105 = arith.constant 1.000000e-03 : f32
    %311 = vector.broadcast %cst_105 : f32 to vector<2x1x16x1xf32>
    %312 = arith.addf %310, %311 : vector<2x1x16x1xf32>
    %cst_106 = arith.constant 1.000000e+00 : f32
    %313 = vector.broadcast %cst_106 : f32 to vector<2x1x16x1xf32>
    %314 = arith.divf %313, %312 : vector<2x1x16x1xf32>
    %315 = vector.broadcast %314 : vector<2x1x16x1xf32> to vector<2x1x16x11xf32>
    %316 = arith.mulf %304, %315 : vector<2x1x16x11xf32>
    %cst_107 = arith.constant dense<0.000000e+00> : vector<2x16xf32>
    %317 = vector.multi_reduction <add>, %294, %cst_107 [1, 3] : vector<2x1x16x11xf32> to vector<2x16xf32>
    %318 = vector.shape_cast %317 : vector<2x16xf32> to vector<2x1x16x1xf32>
    %cst_108 = arith.constant 0.0909090936 : f32
    %319 = vector.broadcast %cst_108 : f32 to vector<2x1x16x1xf32>
    %320 = arith.mulf %318, %319 : vector<2x1x16x1xf32>
    %321 = vector.broadcast %320 : vector<2x1x16x1xf32> to vector<2x1x16x11xf32>
    %322 = arith.subf %294, %321 : vector<2x1x16x11xf32>
    %323 = arith.mulf %322, %322 : vector<2x1x16x11xf32>
    %cst_109 = arith.constant dense<0.000000e+00> : vector<2x16xf32>
    %324 = vector.multi_reduction <add>, %323, %cst_109 [1, 3] : vector<2x1x16x11xf32> to vector<2x16xf32>
    %325 = vector.shape_cast %324 : vector<2x16xf32> to vector<2x1x16x1xf32>
    %cst_110 = arith.constant 1.000000e-01 : f32
    %326 = vector.broadcast %cst_110 : f32 to vector<2x1x16x1xf32>
    %327 = arith.mulf %325, %326 : vector<2x1x16x1xf32>
    %328 = math.sqrt %327 : vector<2x1x16x1xf32>
    %cst_111 = arith.constant 1.000000e-03 : f32
    %329 = vector.broadcast %cst_111 : f32 to vector<2x1x16x1xf32>
    %330 = arith.addf %328, %329 : vector<2x1x16x1xf32>
    %cst_112 = arith.constant 1.000000e+00 : f32
    %331 = vector.broadcast %cst_112 : f32 to vector<2x1x16x1xf32>
    %332 = arith.divf %331, %330 : vector<2x1x16x1xf32>
    %333 = vector.broadcast %332 : vector<2x1x16x1xf32> to vector<2x1x16x11xf32>
    %334 = arith.mulf %322, %333 : vector<2x1x16x11xf32>
    %cst_113 = arith.constant dense<0.000000e+00> : vector<2x16xf32>
    %335 = vector.multi_reduction <add>, %296, %cst_113 [1, 3] : vector<2x1x16x11xf32> to vector<2x16xf32>
    %336 = vector.shape_cast %335 : vector<2x16xf32> to vector<2x1x16x1xf32>
    %cst_114 = arith.constant 0.0909090936 : f32
    %337 = vector.broadcast %cst_114 : f32 to vector<2x1x16x1xf32>
    %338 = arith.mulf %336, %337 : vector<2x1x16x1xf32>
    %339 = vector.broadcast %338 : vector<2x1x16x1xf32> to vector<2x1x16x11xf32>
    %340 = arith.subf %296, %339 : vector<2x1x16x11xf32>
    %341 = arith.mulf %340, %340 : vector<2x1x16x11xf32>
    %cst_115 = arith.constant dense<0.000000e+00> : vector<2x16xf32>
    %342 = vector.multi_reduction <add>, %341, %cst_115 [1, 3] : vector<2x1x16x11xf32> to vector<2x16xf32>
    %343 = vector.shape_cast %342 : vector<2x16xf32> to vector<2x1x16x1xf32>
    %cst_116 = arith.constant 1.000000e-01 : f32
    %344 = vector.broadcast %cst_116 : f32 to vector<2x1x16x1xf32>
    %345 = arith.mulf %343, %344 : vector<2x1x16x1xf32>
    %346 = math.sqrt %345 : vector<2x1x16x1xf32>
    %cst_117 = arith.constant 1.000000e-03 : f32
    %347 = vector.broadcast %cst_117 : f32 to vector<2x1x16x1xf32>
    %348 = arith.addf %346, %347 : vector<2x1x16x1xf32>
    %cst_118 = arith.constant 1.000000e+00 : f32
    %349 = vector.broadcast %cst_118 : f32 to vector<2x1x16x1xf32>
    %350 = arith.divf %349, %348 : vector<2x1x16x1xf32>
    %351 = vector.broadcast %350 : vector<2x1x16x1xf32> to vector<2x1x16x11xf32>
    %352 = arith.mulf %340, %351 : vector<2x1x16x11xf32>
    %cst_119 = arith.constant dense<0.000000e+00> : vector<2x16xf32>
    %353 = vector.multi_reduction <add>, %298, %cst_119 [1, 3] : vector<2x1x16x11xf32> to vector<2x16xf32>
    %354 = vector.shape_cast %353 : vector<2x16xf32> to vector<2x1x16x1xf32>
    %cst_120 = arith.constant 0.0909090936 : f32
    %355 = vector.broadcast %cst_120 : f32 to vector<2x1x16x1xf32>
    %356 = arith.mulf %354, %355 : vector<2x1x16x1xf32>
    %357 = vector.broadcast %356 : vector<2x1x16x1xf32> to vector<2x1x16x11xf32>
    %358 = arith.subf %298, %357 : vector<2x1x16x11xf32>
    %359 = arith.mulf %358, %358 : vector<2x1x16x11xf32>
    %cst_121 = arith.constant dense<0.000000e+00> : vector<2x16xf32>
    %360 = vector.multi_reduction <add>, %359, %cst_121 [1, 3] : vector<2x1x16x11xf32> to vector<2x16xf32>
    %361 = vector.shape_cast %360 : vector<2x16xf32> to vector<2x1x16x1xf32>
    %cst_122 = arith.constant 1.000000e-01 : f32
    %362 = vector.broadcast %cst_122 : f32 to vector<2x1x16x1xf32>
    %363 = arith.mulf %361, %362 : vector<2x1x16x1xf32>
    %364 = math.sqrt %363 : vector<2x1x16x1xf32>
    %cst_123 = arith.constant 1.000000e-03 : f32
    %365 = vector.broadcast %cst_123 : f32 to vector<2x1x16x1xf32>
    %366 = arith.addf %364, %365 : vector<2x1x16x1xf32>
    %cst_124 = arith.constant 1.000000e+00 : f32
    %367 = vector.broadcast %cst_124 : f32 to vector<2x1x16x1xf32>
    %368 = arith.divf %367, %366 : vector<2x1x16x1xf32>
    %369 = vector.broadcast %368 : vector<2x1x16x1xf32> to vector<2x1x16x11xf32>
    %370 = arith.mulf %358, %369 : vector<2x1x16x11xf32>
    %371 = tpu.concatenate %316, %334, %352, %370 in 3 : vector<2x1x16x11xf32>, vector<2x1x16x11xf32>, vector<2x1x16x11xf32>, vector<2x1x16x11xf32> -> vector<2x1x16x44xf32>
    %372 = arith.mulf %371, %371 : vector<2x1x16x44xf32>
    %cst_125 = arith.constant dense<0.000000e+00> : vector<2x1xf32>
    %373 = vector.multi_reduction <add>, %372, %cst_125 [2, 3] : vector<2x1x16x44xf32> to vector<2x1xf32>
    %374 = vector.shape_cast %373 : vector<2x1xf32> to vector<2x1x1x1xf32>
    %375 = math.sqrt %374 : vector<2x1x1x1xf32>
    %cst_126 = arith.constant 9.99999996E-13 : f32
    %376 = vector.broadcast %cst_126 : f32 to vector<2x1x1x1xf32>
    %377 = arith.maximumf %375, %376 : vector<2x1x1x1xf32>
    %cst_127 = arith.constant 1.000000e+00 : f32
    %378 = vector.broadcast %cst_127 : f32 to vector<2x1x1x1xf32>
    %379 = arith.divf %378, %377 : vector<2x1x1x1xf32>
    %380 = vector.broadcast %379 : vector<2x1x1x1xf32> to vector<2x1x16x44xf32>
    %381 = arith.mulf %371, %380 : vector<2x1x16x44xf32>
    %c0_128 = arith.constant 0 : index
    %c0_129 = arith.constant 0 : index
    %c0_130 = arith.constant 0 : index
    %c0_131 = arith.constant 0 : index
    %382 = vector.load %arg3[%c0_128, %c0_129, %c0_130, %c0_131] : memref<2x1x16x44xf32, #tpu.memory_space<vmem>>, vector<2x1x16x44xf32>
    tpu.vector_store %arg3[%c0_128, %c0_129, %c0_130, %c0_131], %381 {strides = array<i32>} : memref<2x1x16x44xf32, #tpu.memory_space<vmem>>, vector<2x1x16x44xf32>,
    return
  }
  func.func @transform_0(%arg0: i32) -> (i32, i32, i32, i32, i32) {
    %c0_i32 = arith.constant 0 : i32
    %c0_i32_0 = arith.constant 0 : i32
    %c0_i32_1 = arith.constant 0 : i32
    %c0_i32_2 = arith.constant 0 : i32
    %c0_i32_3 = arith.constant 0 : i32
    %c0_i32_4 = arith.constant 0 : i32
    return %c0_i32, %c0_i32_0, %c0_i32_1, %c0_i32_2, %c0_i32_3 : i32, i32, i32, i32, i32
  }
  func.func @transform_1(%arg0: i32) -> (i32, i32, i32) {
    %c0_i32 = arith.constant 0 : i32
    %c0_i32_0 = arith.constant 0 : i32
    %c0_i32_1 = arith.constant 0 : i32
    %c0_i32_2 = arith.constant 0 : i32
    return %c0_i32, %c0_i32_0, %c0_i32_1 : i32, i32, i32
  }
  func.func @transform_2(%arg0: i32) -> (i32, i32, i32, i32) {
    %c0_i32 = arith.constant 0 : i32
    %c0_i32_0 = arith.constant 0 : i32
    %c0_i32_1 = arith.constant 0 : i32
    %c0_i32_2 = arith.constant 0 : i32
    %c0_i32_3 = arith.constant 0 : i32
    return %c0_i32, %c0_i32_0, %c0_i32_1, %c0_i32_2 : i32, i32, i32, i32
  }
}

</mosaic_0001>

<bundles_post_ra>
// kernel: tpu_custom_call.1
= control target key start
LH: loop header
LB: loop body
LE: loop exit
PB: predicated region body
PF: predicated region fallthrough
CT: control target
= control target key end

     0   :  { %vm36_vm0 = vcmask 171008   ;;  %s3374_s0 = inlined_call_operand.vmem [shape: f32[2,1,3,16,21], index: 0, kind: input, shape index: {}]   ;;  %s3375_s1 = inlined_call_operand.vmem [shape: f32[42,16,16], index: 1, kind: input, shape index: {}]   ;;  %s3376_s2 = inlined_call_operand.hbm [shape: f32[2,1,16,44], index: 2, kind: output, shape index: {}]  }
   0x1   :  { %v18_v0 = vld [vmem:[%s3374_s0 + $0x30] sm:$0xff]  ;;  %v20_v1 = vld [vmem:[%s3374_s0 + $0x40] sm:$0xff]  ;;  %v19_v8 = vld [vmem:[%s3374_s0 + $0x38] sm:$0xff] }
   0x2   :  { %v22_v2 = vld [vmem:[%s3374_s0 + $0x50] sm:$0xff]  ;;  %v26_v3 = vadd.f32 %v20_v1, %v18_v0  ;;  %v12_v4 = vld [vmem:[%s3374_s0] sm:$0xff]  ;;  %v21_v9 = vld [vmem:[%s3374_s0 + $0x48] sm:$0xff] }
   0x3   :  { %v14_v5 = vld [vmem:[%s3374_s0 + $0x10] sm:$0xff]  ;;  %v16_v6 = vld [vmem:[%s3374_s0 + $0x20] sm:$0xff]  ;;  %v23_v10 = vld [vmem:[%s3374_s0 + $0x58] sm:$0xff]  ;;  %v27_v12 = vadd.f32 %v21_v9, %v19_v8 }
   0x4   :  { %v24_v7 = vadd.f32 %v14_v5, %v12_v4  ;;  %v30_v11 = vadd.f32 %v26_v3, %v22_v2  ;;  %v13_v13 = vld [vmem:[%s3374_s0 + $0x8] sm:$0xff]  ;;  %v15_v14 = vld [vmem:[%s3374_s0 + $0x18] sm:$0xff] }
   0x5   :  { %v17_v15 = vld [vmem:[%s3374_s0 + $0x28] sm:$0xff]  ;;  %v25_v17 = vadd.f32 %v15_v14, %v13_v13  ;;  %v31_v19 = vadd.f32 %v27_v12, %v23_v10 }
   0x6   :  { %v28_v16 = vadd.f32 %v24_v7, %v16_v6  ;;  %v2023_v18 = vmul.f32 0.33333334, %v30_v11 }
   0x7   :  { %v29_v21 = vadd.f32 %v25_v17, %v17_v15  ;;  %v2029_v23 = vmul.f32 0.33333334, %v31_v19 }
   0x8   :  { %v2025_v20 = vmul.f32 0.33333334, %v28_v16  ;;  %v43_v22 = vsel %vm36_vm0, %v2023_v18, 0.0 }
   0x9   :  { %44 = vadd.xlane.f32.xlu1 %v43_v22  ;;  %v2033_v25 = vmul.f32 0.33333334, %v29_v21  ;;  %v46_v26 = vsel %vm36_vm0, %v2029_v23, 0.0 }
   0xa   :  { %v37_v24 = vsel %vm36_vm0, %v2025_v20, 0.0 }
   0xb   :  { %38 = vadd.xlane.f32.xlu0 %v37_v24  ;;  %v40_v27 = vsel %vm36_vm0, %v2033_v25, 0.0 }
   0xd   :  { %47 = vadd.xlane.f32.xlu1 %v46_v26 }
   0xf   :  { %41 = vadd.xlane.f32.xlu0 %v40_v27 }
  0x10   :  { %7 = vsyncpa [#allocation3], 0  ;;  %v1755_v28 = vld [vmem:[%s3375_s1 + $0x18] sm:$0xff]  ;;  %s1956_s6 = smov 1   ;;  %v1756_v29 = vld [vmem:[%s3375_s1 + $0x70] sm:$0xff]  ;;  %s1957_s17 = smov 2  }
  0x11   :  { %v1754_v30 = vld [vmem:[%s3375_s1 + $0x10] sm:$0xff]  ;;  %v1757_v31 = vld [vmem:[%s3375_s1 + $0x78] sm:$0xff]  ;;  %v1758_v32 = vld [vmem:[%s3375_s1 + $0x20] sm:$0xff]  ;;  %s1958_s26 = smov 3   ;;  %s1959_s7 = smov 4   ;;  %vm1278_vm9 = vcmask 89088  }
  0x12   :  { %v1759_v33 = vld [vmem:[%s3375_s1 + $0x28] sm:$0xff]  ;;  %v1760_v34 = vld [vmem:[%s3375_s1 + $0x80] sm:$0xff]  ;;  %v1762_v36 = vld [vmem:[%s3375_s1 + $0x30] sm:$0xff]  ;;  %s1960_s16 = smov 5   ;;  %s1964_s29 = smov 124  }
  0x13   :  { %v1761_v35 = vld [vmem:[%s3375_s1 + $0x88] sm:$0xff]  ;;  %v1763_v37 = vld [vmem:[%s3375_s1 + $0x38] sm:$0xff]  ;;  %v1764_v38 = vld [vmem:[%s3375_s1 + $0x90] sm:$0xff]  ;;  %s1965_s30 = smov 123   ;;  %s1967_s24 = smov 22  }
  0x14   :  { %v1765_v39 = vld [vmem:[%s3375_s1 + $0x98] sm:$0xff]  ;;  %v1766_v40 = vld [vmem:[%s3375_s1 + $0x40] sm:$0xff]  ;;  %v1767_v41 = vld [vmem:[%s3375_s1 + $0x48] sm:$0xff]  ;;  %s1968_s25 = smov 33  }
  0x15   :  { %v1768_v42 = vld [vmem:[%s3375_s1 + $0xa0] sm:$0xff]  ;;  %v1769_v43 = vld [vmem:[%s3375_s1 + $0xa8] sm:$0xff]  ;;  %v1770_v44 = vld [vmem:[%s3375_s1 + $0x50] sm:$0xff] }
  0x16   :  { %v1771_v45 = vld [vmem:[%s3375_s1 + $0x58] sm:$0xff]  ;;  %v1772_v46 = vld [vmem:[%s3375_s1 + $0xb0] sm:$0xff]  ;;  %v1788_v52 = vld [vmem:[%s3375_s1 + $0x160] sm:$0xff] }
  0x17   :  { %v1773_v47 = vld [vmem:[%s3375_s1 + $0xb8] sm:$0xff]  ;;  %v1784_v48 = vld [vmem:[%s3375_s1 + $0x150] sm:$0xff]  ;;  %v1789_v53 = vld [vmem:[%s3375_s1 + $0x168] sm:$0xff] }
  0x18   :  { %v1785_v49 = vld [vmem:[%s3375_s1 + $0x158] sm:$0xff]  ;;  %v1810_v50 = vld [vmem:[%s3375_s1 + $0x1b0] sm:$0xff]  ;;  %v1814_v56 = vld [vmem:[%s3375_s1 + $0x1c0] sm:$0xff] }
  0x19   :  { %v1811_v51 = vld [vmem:[%s3375_s1 + $0x1b8] sm:$0xff]  ;;  %v1812_v54 = vld [vmem:[%s3375_s1 + $0x210] sm:$0xff]  ;;  %v1815_v57 = vld [vmem:[%s3375_s1 + $0x1c8] sm:$0xff] }
  0x1a   :  { %v1813_v55 = vld [vmem:[%s3375_s1 + $0x218] sm:$0xff]  ;;  %v1792_v58 = vld [vmem:[%s3375_s1 + $0x170] sm:$0xff]  ;;  %v1816_v60 = vld [vmem:[%s3375_s1 + $0x220] sm:$0xff] }
  0x1b   :  { %v1793_v59 = vld [vmem:[%s3375_s1 + $0x178] sm:$0xff]  ;;  %v1817_v61 = vld [vmem:[%s3375_s1 + $0x228] sm:$0xff]  ;;  %v1818_v62 = vld [vmem:[%s3375_s1 + $0x1d0] sm:$0xff] }
  0x1c   :  { %v1819_v63 = vld [vmem:[%s3375_s1 + $0x1d8] sm:$0xff]  ;;  %v1796_v0 = vld [vmem:[%s3375_s1 + $0x180] sm:$0xff]  ;;  %v1797_v1 = vld [vmem:[%s3375_s1 + $0x188] sm:$0xff] }
  0x1d   :  { %v1820_v2 = vld [vmem:[%s3375_s1 + $0x230] sm:$0xff]  ;;  %v1821_v3 = vld [vmem:[%s3375_s1 + $0x238] sm:$0xff]  ;;  %v1822_v4 = vld [vmem:[%s3375_s1 + $0x1e0] sm:$0xff] }
  0x1e   :  { %155 = vrot.lane.b32.xlu1 %v1755_v28, %s1956_s6  ;;  %v1823_v5 = vld [vmem:[%s3375_s1 + $0x1e8] sm:$0xff]  ;;  %v1800_v6 = vld [vmem:[%s3375_s1 + $0x190] sm:$0xff]  ;;  %v1801_v7 = vld [vmem:[%s3375_s1 + $0x198] sm:$0xff] }
  0x1f   :  { %v1824_v8 = vld [vmem:[%s3375_s1 + $0x240] sm:$0xff]  ;;  %v1825_v9 = vld [vmem:[%s3375_s1 + $0x248] sm:$0xff]  ;;  %v1826_v10 = vld [vmem:[%s3375_s1 + $0x1f0] sm:$0xff] }
  0x20   :  { %v1827_v11 = vld [vmem:[%s3375_s1 + $0x1f8] sm:$0xff]  ;;  %v1828_v12 = vld [vmem:[%s3375_s1 + $0x250] sm:$0xff]  ;;  %v1786_v16 = vld [vmem:[%s3375_s1 + $0x100] sm:$0xff] }
  0x21   :  { %v1829_v13 = vld [vmem:[%s3375_s1 + $0x258] sm:$0xff]  ;;  %v1782_v14 = vld [vmem:[%s3375_s1 + $0xf0] sm:$0xff]  ;;  %v1787_v17 = vld [vmem:[%s3375_s1 + $0x108] sm:$0xff] }
  0x22   :  { %188 = vrot.lane.b32.xlu1 %v1756_v29, %s1956_s6  ;;  %v1783_v15 = vld [vmem:[%s3375_s1 + $0xf8] sm:$0xff]  ;;  %v1790_v19 = vld [vmem:[%s3375_s1 + $0x110] sm:$0xff]  ;;  %v1794_v22 = vld [vmem:[%s3375_s1 + $0x120] sm:$0xff] }
  0x23   :  { %v1791_v21 = vld [vmem:[%s3375_s1 + $0x118] sm:$0xff]  ;;  %v1795_v24 = vld [vmem:[%s3375_s1 + $0x128] sm:$0xff]  ;;  %v1798_v26 = vld [vmem:[%s3375_s1 + $0x130] sm:$0xff] }
  0x24   :  { %v1799_v29 = vld [vmem:[%s3375_s1 + $0x138] sm:$0xff] }
  0x25   :  { %153 = vrot.lane.b32.xlu0 %v1754_v30, %s1956_s6 }
  0x26   :  { %190 = vrot.lane.b32.xlu1 %v1757_v31, %s1956_s6 }
  0x29   :  { %223 = vrot.lane.b32.xlu0 %v1758_v32, %s1957_s17 }
  0x2a   :  { %225 = vrot.lane.b32.xlu1 %v1759_v33, %s1957_s17 }
  0x2d   :  { %258 = vrot.lane.b32.xlu0 %v1760_v34, %s1957_s17 }
  0x2e   :  { %260 = vrot.lane.b32.xlu1 %v1761_v35, %s1957_s17 }
  0x31   :  { %293 = vrot.lane.b32.xlu0 %v1762_v36, %s1958_s26 }
  0x32   :  { %295 = vrot.lane.b32.xlu1 %v1763_v37, %s1958_s26 }
  0x35   :  { %328 = vrot.lane.b32.xlu0 %v1764_v38, %s1958_s26 }
  0x36   :  { %330 = vrot.lane.b32.xlu1 %v1765_v39, %s1958_s26 }
  0x39   :  { %363 = vrot.lane.b32.xlu0 %v1766_v40, %s1959_s7 }
  0x3a   :  { %365 = vrot.lane.b32.xlu1 %v1767_v41, %s1959_s7 }
  0x3d   :  { %398 = vrot.lane.b32.xlu0 %v1768_v42, %s1959_s7 }
  0x3e   :  { %400 = vrot.lane.b32.xlu1 %v1769_v43, %s1959_s7 }
  0x41   :  { %433 = vrot.lane.b32.xlu0 %v1770_v44, %s1960_s16 }
  0x42   :  { %435 = vrot.lane.b32.xlu1 %v1771_v45, %s1960_s16 }
  0x45   :  { %468 = vrot.lane.b32.xlu0 %v1772_v46, %s1960_s16 }
  0x46   :  { %470 = vrot.lane.b32.xlu1 %v1773_v47, %s1960_s16 }
  0x49   :  { %574 = vrot.lane.b32.xlu0 %v1784_v48, %s1956_s6 }
  0x4a   :  { %576 = vrot.lane.b32.xlu1 %v1785_v49, %s1956_s6 }
  0x4d   :  { %917 = vrot.lane.b32.xlu0 %v1810_v50, %s1956_s6 }
  0x4e   :  { %919 = vrot.lane.b32.xlu1 %v1811_v51, %s1956_s6 }
  0x51   :  { %644 = vrot.lane.b32.xlu0 %v1788_v52, %s1957_s17 }
  0x52   :  { %646 = vrot.lane.b32.xlu1 %v1789_v53, %s1957_s17 }
  0x55   :  { %952 = vrot.lane.b32.xlu0 %v1812_v54, %s1956_s6 }
  0x56   :  { %954 = vrot.lane.b32.xlu1 %v1813_v55, %s1956_s6 }
  0x59   :  { %987 = vrot.lane.b32.xlu0 %v1814_v56, %s1957_s17 }
  0x5a   :  { %989 = vrot.lane.b32.xlu1 %v1815_v57, %s1957_s17 }
  0x5d   :  { %714 = vrot.lane.b32.xlu0 %v1792_v58, %s1958_s26 }
  0x5e   :  { %716 = vrot.lane.b32.xlu1 %v1793_v59, %s1958_s26 }
  0x61   :  { %1022 = vrot.lane.b32.xlu0 %v1816_v60, %s1957_s17 }
  0x62   :  { %1024 = vrot.lane.b32.xlu1 %v1817_v61, %s1957_s17 }
  0x65   :  { %1057 = vrot.lane.b32.xlu0 %v1818_v62, %s1958_s26 }
  0x66   :  { %1059 = vrot.lane.b32.xlu1 %v1819_v63, %s1958_s26 }
  0x69   :  { %784 = vrot.lane.b32.xlu0 %v1796_v0, %s1959_s7 }
  0x6a   :  { %786 = vrot.lane.b32.xlu1 %v1797_v1, %s1959_s7 }
  0x6d   :  { %1092 = vrot.lane.b32.xlu0 %v1820_v2, %s1958_s26 }
  0x6e   :  { %1094 = vrot.lane.b32.xlu1 %v1821_v3, %s1958_s26 }
  0x71   :  { %1127 = vrot.lane.b32.xlu0 %v1822_v4, %s1959_s7 }
  0x72   :  { %1129 = vrot.lane.b32.xlu1 %v1823_v5, %s1959_s7 }
  0x75   :  { %854 = vrot.lane.b32.xlu0 %v1800_v6, %s1960_s16 }
  0x76   :  { %856 = vrot.lane.b32.xlu1 %v1801_v7, %s1960_s16 }
  0x79   :  { %1162 = vrot.lane.b32.xlu0 %v1824_v8, %s1959_s7 }
  0x7a   :  { %1164 = vrot.lane.b32.xlu1 %v1825_v9, %s1959_s7 }
  0x7d   :  { %1197 = vrot.lane.b32.xlu0 %v1826_v10, %s1960_s16 }
  0x7e   :  { %1199 = vrot.lane.b32.xlu1 %v1827_v11, %s1960_s16 }
  0x81   :  { %1232 = vrot.lane.b32.xlu0 %v1828_v12, %s1960_s16 }
  0x82   :  { %1234 = vrot.lane.b32.xlu1 %v1829_v13, %s1960_s16 }
  0x85   :  { %539 = vrot.lane.b32.xlu0 %v1782_v14, %s1956_s6 }
  0x86   :  { %541 = vrot.lane.b32.xlu1 %v1783_v15, %s1956_s6 }
  0x89   :  { %609 = vrot.lane.b32.xlu0 %v1786_v16, %s1957_s17 }
  0x8a   :  { %611 = vrot.lane.b32.xlu1 %v1787_v17, %s1957_s17  ;;  %s1969_s17 = smov [#allocation2]  }
  0x8b   :  { %s1737_s27 = sshll.u32 %s1969_s17, 4  ;;  %s1738_s27 = int_to_ptr.vmem [resolvable:$true] %s1737_s27 }
  0x8c   :  { %s1934_s28 = scalar_lea.vmem %s1738_s27, 512  ;;  %p1939_p1 = scmp.lt.s32.totalorder %s1738_s27, %s1738_s27 }
  0x8d   :  { %679 = vrot.lane.b32.xlu0 %v1790_v19, %s1958_s26  ;;  %p1935_p0 = scmp.ne.s32.totalorder %s1738_s27, %s1934_s28  ;;  %p1940_p2 = scmp.lt.s32.totalorder %s1934_s28, %s1934_s28 }
  0x8e   :  { %681 = vrot.lane.b32.xlu1 %v1791_v21, %s1958_s26  ;;  %s1961_s26 = smov 127  }
  0x8f   :  { %p1941_p3 = por %p1940_p2, %p1939_p1 }
  0x91   :  { %749 = vrot.lane.b32.xlu0 %v1794_v22, %s1959_s7  ;;  %p1942_p4 = pnand %p1941_p3, %p1935_p0 }
  0x92   :  { %751 = vrot.lane.b32.xlu1 %v1795_v24, %s1959_s7  ;;  %v45_v27 = vpop.xlane.xlu1 %44  ;;  %s1962_s7 = smov 126  }
  0x93   :  { %v51_v41 = vmul.f32 0.04761905, %v45_v27 }
  0x94   :  { %v39_v28 = vpop.xlane.xlu0 %38 }
  0x95   :  { %819 = vrot.lane.b32.xlu0 %v1798_v26, %s1960_s16  ;;  %v49_v38 = vmul.f32 0.04761905, %v39_v28  ;;  %v2303_v46 = vsub.f32 %v2023_v18, %v51_v41 }
  0x96   :  { %821 = vrot.lane.b32.xlu1 %v1799_v29, %s1960_s16  ;;  %v48_v30 = vpop.xlane.xlu1 %47  ;;  %s1963_s16 = smov 125  }
  0x97   :  { %v2296_v42 = vsub.f32 %v2025_v20, %v49_v38  ;;  %v52_v50 = vmul.f32 0.04761905, %v48_v30  ;;  %v59_v53 = vmul.f32 %v2303_v46, %v2303_v46 }
  0x98   :  { %v42_v31 = vpop.xlane.xlu0 %41 }
  0x99   :  { %v50_v45 = vmul.f32 0.04761905, %v42_v31  ;;  %v57_v48 = vmul.f32 %v2296_v42, %v2296_v42  ;;  %v2322_v54 = vsub.f32 %v2029_v23, %v52_v50 }
  0x9a   :  { %v2279_v32 = vpop.permute.xlu1 %155 }
  0x9b   :  { %v2312_v51 = vsub.f32 %v2033_v25, %v50_v45  ;;  %v61_v52 = vsel %vm36_vm0, %v57_v48, 0.0  ;;  %v67_v25 = vsel %vm36_vm0, %v59_v53, 0.0  ;;  %v60_v58 = vmul.f32 %v2322_v54, %v2322_v54 }
  0x9c   :  { %v2281_v33 = vpop.permute.xlu0 %153 }
  0x9d   :  { %v58_v55 = vmul.f32 %v2312_v51, %v2312_v51  ;;  %v70_v23 = vsel %vm36_vm0, %v60_v58, 0.0 }
  0x9e   :  { %v2283_v34 = vpop.permute.xlu1 %188 }
  0x9f   :  { %v64_v57 = vsel %vm36_vm0, %v58_v55, 0.0 }
  0xa0   :  { %v2285_v35 = vpop.permute.xlu0 %223 }
  0xa2   :  { %v2287_v36 = vpop.permute.xlu1 %190 }
  0xa4   :  { %v2289_v37 = vpop.permute.xlu0 %258 }
  0xa6   :  { %v2291_v39 = vpop.permute.xlu1 %225 }
  0xa8   :  { %v2293_v40 = vpop.permute.xlu0 %293 }
  0xaa   :  { %v2298_v43 = vpop.permute.xlu1 %260 }
  0xac   :  { %v2300_v44 = vpop.permute.xlu0 %328 }
  0xae   :  { %v2305_v47 = vpop.permute.xlu1 %295 }
  0xb0   :  { %v2309_v49 = vpop.permute.xlu0 %363 }
  0xb2   :  { %v2314_v20 = vpop.permute.xlu1 %330 }
  0xb4   :  { %62 = vadd.xlane.f32.xlu0 %v61_v52  ;;  %v2319_v18 = vpop.permute.xlu0 %398 }
  0xb6   :  { %v2326_v56 = vpop.permute.xlu1 %365 }
  0xb8   :  { %68 = vadd.xlane.f32.xlu0 %v67_v25  ;;  %v2332_v59 = vpop.permute.xlu0 %433 }
  0xba   :  { %65 = vadd.xlane.f32.xlu1 %v64_v57  ;;  %v2334_v60 = vpop.permute.xlu1 %400 }
  0xbc   :  { %v2337_v61 = vpop.permute.xlu0 %468 }
  0xbe   :  { %71 = vadd.xlane.f32.xlu1 %v70_v23  ;;  %v2339_v62 = vpop.permute.xlu1 %435 }
  0xc0   :  { %v2341_v63 = vpop.permute.xlu0 %574 }
  0xc2   :  { %v2343_v0 = vpop.permute.xlu1 %470 }
  0xc4   :  { %v2345_v1 = vpop.permute.xlu0 %917 }
  0xc6   :  { %v2347_v2 = vpop.permute.xlu1 %576 }
  0xc8   :  { %v2349_v3 = vpop.permute.xlu0 %644 }
  0xca   :  { %v2351_v4 = vpop.permute.xlu1 %919 }
  0xcc   :  { %v2353_v5 = vpop.permute.xlu0 %952 }
  0xce   :  { %v2355_v6 = vpop.permute.xlu1 %646 }
  0xd0   :  { %v2357_v7 = vpop.permute.xlu0 %987 }
  0xd2   :  { %v2359_v8 = vpop.permute.xlu1 %954 }
  0xd4   :  { %v2361_v9 = vpop.permute.xlu0 %714 }
  0xd5   :  { %3408 = vst [vmem:[#allocation5_spill] sm:$0xff] %v2361_v9 }
  0xd6   :  { %v2363_v10 = vpop.permute.xlu1 %989 }
  0xd8   :  { %v2365_v11 = vpop.permute.xlu0 %1022 }
  0xd9   :  { %3409 = vst [vmem:[#allocation6_spill] sm:$0xff] %v2365_v11 }
  0xda   :  { %v2367_v12 = vpop.permute.xlu1 %716 }
  0xdb   :  { %3410 = vst [vmem:[#allocation7_spill] sm:$0xff] %v2367_v12 }
  0xdc   :  { %v2369_v13 = vpop.permute.xlu0 %1057 }
  0xdd   :  { %3411 = vst [vmem:[#allocation8_spill] sm:$0xff] %v2369_v13 }
  0xde   :  { %v2371_v14 = vpop.permute.xlu1 %1024 }
  0xdf   :  { %3412 = vst [vmem:[#allocation9_spill] sm:$0xff] %v2371_v14 }
  0xe0   :  { %v2373_v15 = vpop.permute.xlu0 %784 }
  0xe1   :  { %3413 = vst [vmem:[#allocation10_spill] sm:$0xff] %v2373_v15 }
  0xe2   :  { %v2375_v16 = vpop.permute.xlu1 %1059 }
  0xe3   :  { %3414 = vst [vmem:[#allocation11_spill] sm:$0xff] %v2375_v16 }
  0xe4   :  { %v2377_v17 = vpop.permute.xlu0 %1092 }
  0xe5   :  { %3415 = vst [vmem:[#allocation12_spill] sm:$0xff] %v2377_v17 }
  0xe6   :  { %v2379_v19 = vpop.permute.xlu1 %786 }
  0xe7   :  { %3416 = vst [vmem:[#allocation13_spill] sm:$0xff] %v2379_v19 }
  0xe8   :  { %v2381_v21 = vpop.permute.xlu0 %1127 }
  0xe9   :  { %3417 = vst [vmem:[#allocation14_spill] sm:$0xff] %v2381_v21 }
  0xea   :  { %v2383_v22 = vpop.permute.xlu1 %1094 }
  0xeb   :  { %3418 = vst [vmem:[#allocation15_spill] sm:$0xff] %v2383_v22  ;;  %v1752_v22 = vld [vmem:[%s3375_s1 + $0xd0] sm:$0xff] }
  0xec   :  { %v2385_v24 = vpop.permute.xlu0 %854 }
  0xed   :  { %3419 = vst [vmem:[#allocation16_spill] sm:$0xff] %v2385_v24 }
  0xee   :  { %v2387_v26 = vpop.permute.xlu1 %1129 }
  0xef   :  { %3420 = vst [vmem:[#allocation17_spill] sm:$0xff] %v2387_v26 }
  0xf0   :  { %v2389_v27 = vpop.permute.xlu0 %1162 }
  0xf1   :  { %3421 = vst [vmem:[#allocation18_spill] sm:$0xff] %v2389_v27 }
  0xf2   :  { %v2391_v28 = vpop.permute.xlu1 %856 }
  0xf3   :  { %3422 = vst [vmem:[#allocation19_spill] sm:$0xff] %v2391_v28 }
  0xf4   :  { %v2393_v29 = vpop.permute.xlu0 %1197 }
  0xf5   :  { %3423 = vst [vmem:[#allocation20_spill] sm:$0xff] %v2393_v29 }
  0xf6   :  { %v2395_v30 = vpop.permute.xlu1 %1164 }
  0xf7   :  { %3424 = vst [vmem:[#allocation21_spill] sm:$0xff] %v2395_v30 }
  0xf8   :  { %v2397_v31 = vpop.permute.xlu0 %1232 }
  0xf9   :  { %3425 = vst [vmem:[#allocation22_spill] sm:$0xff] %v2397_v31 }
  0xfa   :  { %v2399_v38 = vpop.permute.xlu1 %1199 }
  0xfb   :  { %3426 = vst [vmem:[#allocation23_spill] sm:$0xff] %v2399_v38 }
  0xfc   :  { %v2401_v41 = vpop.permute.xlu0 %539 }
  0xfd   :  { %3427 = vst [vmem:[#allocation24_spill] sm:$0xff] %v2401_v41 }
  0xfe   :  { %v2403_v45 = vpop.permute.xlu1 %1234 }
  0xff   :  { %3428 = vst [vmem:[#allocation25_spill] sm:$0xff] %v2403_v45 }
 0x100   :  { %v2405_v48 = vpop.permute.xlu0 %609 }
 0x101   :  { %3429 = vst [vmem:[#allocation26_spill] sm:$0xff] %v2405_v48 }
 0x102   :  { %v2407_v50 = vpop.permute.xlu1 %541 }
 0x103   :  { %3430 = vst [vmem:[#allocation27_spill] sm:$0xff] %v2407_v50 }
 0x104   :  { %v2409_v52 = vpop.permute.xlu0 %679 }
 0x105   :  { %3431 = vst [vmem:[#allocation28_spill] sm:$0xff] %v2409_v52 }
 0x106   :  { %v2411_v53 = vpop.permute.xlu1 %611 }
 0x107   :  { %3432 = vst [vmem:[#allocation29_spill] sm:$0xff] %v2411_v53 }
 0x108   :  { %v2413_v55 = vpop.permute.xlu0 %749 }
 0x109   :  { %3433 = vst [vmem:[#allocation30_spill] sm:$0xff] %v2413_v55 }
 0x10a   :  { %v2415_v25 = vpop.permute.xlu1 %681 }
 0x10b   :  { %3434 = vst [vmem:[#allocation31_spill] sm:$0xff] %v2415_v25 }
 0x10c   :  { %v2417_v57 = vpop.permute.xlu0 %819 }
 0x10d   :  { %3435 = vst [vmem:[#allocation32_spill] sm:$0xff] %v2417_v57 }
 0x10e   :  { %v2419_v58 = vpop.permute.xlu1 %751 }
 0x10f   :  { %3436 = vst [vmem:[#allocation33_spill] sm:$0xff] %v2419_v58 }
 0x112   :  { %v2421_v31 = vpop.permute.xlu1 %821 }
 0x113   :  { %3437 = vst [vmem:[#allocation34_spill] sm:$0xff] %v2421_v31 }
 0x13d   :  { %v63_v23 = vpop.xlane.xlu0 %62 }
 0x13e   :  { %v73_v41 = vmul.f32 0.05, %v63_v23 }
 0x140   :  { %1846 = vrsqrt.f32 %v73_v41  ;;  %vm79_vm1 = vcmp.eq.f32.partialorder %v73_v41, inf  ;;  %v82_v57 = vand.u32 2147483648, %v73_v41  ;;  %vm81_vm2 = vcmp.eq.f32.partialorder %v73_v41, 0.0 }
 0x141   :  { %v69_v48 = vpop.xlane.xlu0 %68 }
 0x142   :  { %v75_v45 = vmul.f32 0.05, %v69_v48 }
 0x143   :  { %v66_v50 = vpop.xlane.xlu1 %65 }
 0x144   :  { %1848 = vrsqrt.f32 %v75_v45  ;;  %v74_v52 = vmul.f32 0.05, %v66_v50  ;;  %vm93_vm3 = vcmp.eq.f32.partialorder %v75_v45, inf  ;;  %v96_v27 = vand.u32 2147483648, %v75_v45 }
 0x145   :  { %vm95_vm4 = vcmp.eq.f32.partialorder %v75_v45, 0.0 }
 0x146   :  { %1850 = vrsqrt.f32 %v74_v52  ;;  %vm86_vm5 = vcmp.eq.f32.partialorder %v74_v52, inf  ;;  %v89_v26 = vand.u32 2147483648, %v74_v52  ;;  %vm88_vm6 = vcmp.eq.f32.partialorder %v74_v52, 0.0 }
 0x147   :  { %v72_v53 = vpop.xlane.xlu1 %71 }
 0x148   :  { %v76_v38 = vmul.f32 0.05, %v72_v53 }
 0x14a   :  { %1852 = vrsqrt.f32 %v76_v38  ;;  %vm100_vm7 = vcmp.eq.f32.partialorder %v76_v38, inf  ;;  %vm102_vm8 = vcmp.eq.f32.partialorder %v76_v38, 0.0 }
 0x14d   :  { %v1847_v55 = vpop.eup %1846 }
 0x14e   :  { %v78_v25 = vmul.f32 %v1847_v55, %v73_v41 }
 0x150   :  { %v80_v29 = vsel %vm79_vm1, %v73_v41, %v78_v25 }
 0x151   :  { %v1849_v58 = vpop.eup %1848  ;;  %v83_v23 = vsel %vm81_vm2, %v82_v57, %v80_v29  ;;  %v103_v57 = vand.u32 2147483648, %v76_v38 }
 0x152   :  { %v105_v30 = vadd.f32 0.001, %v83_v23  ;;  %v92_v31 = vmul.f32 %v1849_v58, %v75_v45 }
 0x153   :  { %v1851_v48 = vpop.eup %1850 }
 0x154   :  { %1854 = vrcp.f32 %v105_v30  ;;  %v94_v28 = vsel %vm93_vm3, %v75_v45, %v92_v31  ;;  %v85_v24 = vmul.f32 %v1851_v48, %v74_v52 }
 0x155   :  { %v97_v50 = vsel %vm95_vm4, %v96_v27, %v94_v28 }
 0x156   :  { %v107_v53 = vadd.f32 0.001, %v97_v50  ;;  %v87_v55 = vsel %vm86_vm5, %v74_v52, %v85_v24 }
 0x157   :  { %v1853_v21 = vpop.eup %1852  ;;  %v90_v41 = vsel %vm88_vm6, %v89_v26, %v87_v55 }
 0x158   :  { %1856 = vrcp.f32 %v107_v53  ;;  %v106_v25 = vadd.f32 0.001, %v90_v41  ;;  %v99_v29 = vmul.f32 %v1853_v21, %v76_v38 }
 0x15a   :  { %1858 = vrcp.f32 %v106_v25  ;;  %v101_v58 = vsel %vm100_vm7, %v76_v38, %v99_v29 }
 0x15b   :  { %v104_v30 = vsel %vm102_vm8, %v103_v57, %v101_v58 }
 0x15c   :  { %v108_v31 = vadd.f32 0.001, %v104_v30 }
 0x15e   :  { %1860 = vrcp.f32 %v108_v31 }
 0x161   :  { %v1855_v27 = vpop.eup %1854 }
 0x162   :  { %v2424_v28 = vmul.f32 %v1855_v27, %v2296_v42 }
 0x164   :  { %v159_v24 = vmul.f32 %v2281_v33, %v2424_v28  ;;  %v264_v55 = vmul.f32 %v2289_v37, %v2424_v28  ;;  %v299_v25 = vmul.f32 %v2293_v40, %v2424_v28  ;;  %v334_v57 = vmul.f32 %v2300_v44, %v2424_v28 }
 0x165   :  { %v1857_v45 = vpop.eup %1856  ;;  %v369_v30 = vmul.f32 %v2309_v49, %v2424_v28  ;;  %v404_v27 = vmul.f32 %v2319_v18, %v2424_v28 }
 0x166   :  { %v2429_v26 = vmul.f32 %v1857_v45, %v2303_v46  ;;  %167 = vrot.lane.b32.xlu0 %v159_v24, %s1961_s26  ;;  %v194_v46 = vmul.f32 %v2283_v34, %v2424_v28  ;;  %v439_v45 = vmul.f32 %v2332_v59, %v2424_v28 }
 0x167   :  { %v1859_v21 = vpop.eup %1858 }
 0x168   :  { %v161_v38 = vmul.f32 %v2281_v33, %v2429_v26  ;;  %v2435_v52 = vmul.f32 %v1859_v21, %v2312_v51  ;;  %v196_v51 = vmul.f32 %v2283_v34, %v2429_v26  ;;  %v231_v34 = vmul.f32 %v2285_v35, %v2429_v26 }
 0x16a   :  { %171 = vrot.lane.b32.xlu0 %v161_v38, %s1961_s26  ;;  %v160_v42 = vmul.f32 %v2279_v32, %v2435_v52  ;;  %v195_v50 = vmul.f32 %v2287_v36, %v2435_v52  ;;  %v230_v53 = vmul.f32 %v2291_v39, %v2435_v52  ;;  %v265_v41 = vmul.f32 %v2298_v43, %v2435_v52 }
 0x16b   :  { %v1861_v23 = vpop.eup %1860  ;;  %v300_v29 = vmul.f32 %v2305_v47, %v2435_v52  ;;  %v335_v58 = vmul.f32 %v2314_v20, %v2435_v52  ;;  %v370_v31 = vmul.f32 %v2326_v56, %v2435_v52  ;;  %v405_v24 = vmul.f32 %v2334_v60, %v2435_v52 }
 0x16c   :  { %v2443_v48 = vmul.f32 %v1861_v23, %v2322_v54  ;;  %169 = vrot.lane.b32.xlu1 %v160_v42, %s1961_s26  ;;  %v229_v54 = vmul.f32 %v2285_v35, %v2424_v28  ;;  %v266_v35 = vmul.f32 %v2289_v37, %v2429_v26  ;;  %v301_v37 = vmul.f32 %v2293_v40, %v2429_v26 }
 0x16d   :  { %v336_v40 = vmul.f32 %v2300_v44, %v2429_v26  ;;  %v371_v44 = vmul.f32 %v2309_v49, %v2429_v26  ;;  %v406_v49 = vmul.f32 %v2319_v18, %v2429_v26  ;;  %v441_v18 = vmul.f32 %v2332_v59, %v2429_v26 }
 0x16e   :  { %202 = vrot.lane.b32.xlu0 %v194_v46, %s1961_s26  ;;  %v162_v33 = vmul.f32 %v2279_v32, %v2443_v48  ;;  %v197_v32 = vmul.f32 %v2287_v36, %v2443_v48  ;;  %v232_v36 = vmul.f32 %v2291_v39, %v2443_v48  ;;  %v267_v39 = vmul.f32 %v2298_v43, %v2443_v48 }
 0x16f   :  { %v302_v43 = vmul.f32 %v2305_v47, %v2443_v48  ;;  %v337_v47 = vmul.f32 %v2314_v20, %v2443_v48  ;;  %v372_v20 = vmul.f32 %v2326_v56, %v2443_v48  ;;  %v407_v56 = vmul.f32 %v2334_v60, %v2443_v48 }
 0x170   :  { %173 = vrot.lane.b32.xlu1 %v162_v33, %s1961_s26  ;;  %v440_v21 = vmul.f32 %v2339_v62, %v2435_v52  ;;  %v474_v38 = vmul.f32 %v2337_v61, %v2424_v28  ;;  %v442_v60 = vmul.f32 %v2339_v62, %v2443_v48  ;;  %v476_v59 = vmul.f32 %v2337_v61, %v2429_v26 }
 0x171   :  { %v475_v42 = vmul.f32 %v2343_v0, %v2435_v52  ;;  %v477_v23 = vmul.f32 %v2343_v0, %v2443_v48 }
 0x172   :  { %206 = vrot.lane.b32.xlu0 %v196_v51, %s1961_s26 }
 0x174   :  { %204 = vrot.lane.b32.xlu1 %v195_v50, %s1961_s26 }
 0x176   :  { %237 = vrot.lane.b32.xlu0 %v229_v54, %s1962_s7 }
 0x178   :  { %208 = vrot.lane.b32.xlu1 %v197_v32, %s1961_s26 }
 0x17a   :  { %241 = vrot.lane.b32.xlu0 %v231_v34, %s1962_s7 }
 0x17c   :  { %239 = vrot.lane.b32.xlu1 %v230_v53, %s1962_s7 }
 0x17e   :  { %272 = vrot.lane.b32.xlu0 %v264_v55, %s1962_s7 }
 0x180   :  { %243 = vrot.lane.b32.xlu1 %v232_v36, %s1962_s7 }
 0x182   :  { %276 = vrot.lane.b32.xlu0 %v266_v35, %s1962_s7 }
 0x184   :  { %274 = vrot.lane.b32.xlu1 %v265_v41, %s1962_s7 }
 0x186   :  { %307 = vrot.lane.b32.xlu0 %v299_v25, %s1963_s16 }
 0x188   :  { %278 = vrot.lane.b32.xlu1 %v267_v39, %s1962_s7 }
 0x18a   :  { %311 = vrot.lane.b32.xlu0 %v301_v37, %s1963_s16 }
 0x18c   :  { %309 = vrot.lane.b32.xlu1 %v300_v29, %s1963_s16 }
 0x18e   :  { %342 = vrot.lane.b32.xlu0 %v334_v57, %s1963_s16 }
 0x190   :  { %313 = vrot.lane.b32.xlu1 %v302_v43, %s1963_s16 }
 0x192   :  { %346 = vrot.lane.b32.xlu0 %v336_v40, %s1963_s16 }
 0x194   :  { %344 = vrot.lane.b32.xlu1 %v335_v58, %s1963_s16 }
 0x196   :  { %377 = vrot.lane.b32.xlu0 %v369_v30, %s1964_s29  ;;  %v121_v30 = vld [vmem:[%s3375_s1] sm:$0xff] }
 0x198   :  { %348 = vrot.lane.b32.xlu1 %v337_v47, %s1963_s16 }
 0x19a   :  { %381 = vrot.lane.b32.xlu0 %v371_v44, %s1964_s29  ;;  %v123_v44 = vmul.f32 %v121_v30, %v2424_v28 }
 0x19c   :  { %379 = vrot.lane.b32.xlu1 %v370_v31, %s1964_s29 }
 0x19e   :  { %412 = vrot.lane.b32.xlu0 %v404_v27, %s1964_s29  ;;  %v1748_v27 = vld [vmem:[%s3375_s1 + $0xc0] sm:$0xff] }
 0x1a0   :  { %383 = vrot.lane.b32.xlu1 %v372_v20, %s1964_s29 }
 0x1a2   :  { %416 = vrot.lane.b32.xlu0 %v406_v49, %s1964_s29  ;;  %v130_v49 = vadd.f32 %v1748_v27, %v123_v44 }
 0x1a4   :  { %414 = vrot.lane.b32.xlu1 %v405_v24, %s1964_s29  ;;  %v125_v24 = vmul.f32 %v121_v30, %v2429_v26 }
 0x1a6   :  { %447 = vrot.lane.b32.xlu0 %v439_v45, %s1965_s30  ;;  %v122_v45 = vld [vmem:[%s3375_s1 + $0x8] sm:$0xff] }
 0x1a8   :  { %418 = vrot.lane.b32.xlu1 %v407_v56, %s1964_s29 }
 0x1aa   :  { %451 = vrot.lane.b32.xlu0 %v441_v18, %s1965_s30  ;;  %v1750_v18 = vld [vmem:[%s3375_s1 + $0x60] sm:$0xff] }
 0x1ac   :  { %449 = vrot.lane.b32.xlu1 %v440_v21, %s1965_s30 }
 0x1ae   :  { %482 = vrot.lane.b32.xlu0 %v474_v38, %s1965_s30 }
 0x1b0   :  { %453 = vrot.lane.b32.xlu1 %v442_v60, %s1965_s30  ;;  %v124_v60 = vmul.f32 %v122_v45, %v2435_v52 }
 0x1b2   :  { %486 = vrot.lane.b32.xlu0 %v476_v59, %s1965_s30  ;;  %v132_v59 = vadd.f32 %v1748_v27, %v125_v24  ;;  %v139_v27 = vmul.f32 %v1750_v18, %v2429_v26  ;;  %v1751_v24 = vld [vmem:[%s3375_s1 + $0x68] sm:$0xff]  ;;  %v1753_v26 = vld [vmem:[%s3375_s1 + $0xd8] sm:$0xff] }
 0x1b4   :  { %484 = vrot.lane.b32.xlu1 %v475_v42, %s1965_s30  ;;  %v1749_v42 = vld [vmem:[%s3375_s1 + $0xc8] sm:$0xff] }
 0x1b5   :  { %v131_v16 = vadd.f32 %v1749_v42, %v124_v60 }
 0x1b8   :  { %488 = vrot.lane.b32.xlu1 %v477_v23, %s1965_s30  ;;  %v137_v23 = vmul.f32 %v1750_v18, %v2424_v28 }
 0x1d8   :  { %v168_v46 = vpop.permute.xlu0 %167 }
 0x1d9   :  { %v179_v38 = vadd.f32 %v168_v46, %v130_v49  ;;  %v126_v46 = vmul.f32 %v122_v45, %v2443_v48  ;;  %v144_v49 = vadd.f32 %v1752_v22, %v137_v23  ;;  %v146_v45 = vadd.f32 %v1752_v22, %v139_v27 }
 0x1dc   :  { %v172_v33 = vpop.permute.xlu0 %171 }
 0x1dd   :  { %v181_v19 = vadd.f32 %v172_v33, %v132_v59  ;;  %v133_v33 = vadd.f32 %v1749_v42, %v126_v46 }
 0x1de   :  { %v170_v62 = vpop.permute.xlu1 %169 }
 0x1df   :  { %v180_v13 = vadd.f32 %v170_v62, %v131_v16 }
 0x1e0   :  { %v203_v51 = vpop.permute.xlu0 %202 }
 0x1e1   :  { %v214_v11 = vadd.f32 %v203_v51, %v144_v49 }
 0x1e2   :  { %v2555_v50 = vpop.permute.xlu1 %173 }
 0x1e3   :  { %v182_v16 = vadd.f32 %v2555_v50, %v133_v33 }
 0x1e4   :  { %v2557_v61 = vpop.permute.xlu0 %206 }
 0x1e6   :  { %v2559_v54 = vpop.permute.xlu1 %204 }
 0x1e8   :  { %v238_v32 = vpop.permute.xlu0 %237 }
 0x1e9   :  { %v249_v30 = vadd.f32 %v238_v32, %v179_v38 }
 0x1ea   :  { %v2561_v34 = vpop.permute.xlu1 %208 }
 0x1ec   :  { %v242_v53 = vpop.permute.xlu0 %241 }
 0x1ed   :  { %v251_v28 = vadd.f32 %v242_v53, %v181_v19 }
 0x1ee   :  { %v240_v55 = vpop.permute.xlu1 %239 }
 0x1ef   :  { %v250_v60 = vadd.f32 %v240_v55, %v180_v13 }
 0x1f0   :  { %v273_v36 = vpop.permute.xlu0 %272 }
 0x1f1   :  { %v284_v18 = vadd.f32 %v273_v36, %v214_v11 }
 0x1f2   :  { %v2563_v35 = vpop.permute.xlu1 %243 }
 0x1f3   :  { %v252_v11 = vadd.f32 %v2563_v35, %v182_v16 }
 0x1f4   :  { %v2565_v0 = vpop.permute.xlu0 %276 }
 0x1f6   :  { %v2567_v41 = vpop.permute.xlu1 %274 }
 0x1f8   :  { %v308_v25 = vpop.permute.xlu0 %307 }
 0x1f9   :  { %v319_v15 = vadd.f32 %v308_v25, %v249_v30  ;;  %v138_v25 = vmul.f32 %v1751_v24, %v2435_v52  ;;  %v140_v52 = vmul.f32 %v1751_v24, %v2443_v48 }
 0x1fa   :  { %v2569_v39 = vpop.permute.xlu1 %278 }
 0x1fb   :  { %v145_v22 = vadd.f32 %v1753_v26, %v138_v25 }
 0x1fc   :  { %v312_v37 = vpop.permute.xlu0 %311 }
 0x1fd   :  { %v321_v12 = vadd.f32 %v312_v37, %v251_v28 }
 0x1fe   :  { %v310_v29 = vpop.permute.xlu1 %309 }
 0x1ff   :  { %v320_v19 = vadd.f32 %v310_v29, %v250_v60 }
 0x200   :  { %v343_v57 = vpop.permute.xlu0 %342 }
 0x201   :  { %v354_v51 = vadd.f32 %v343_v57, %v284_v18 }
 0x202   :  { %v2571_v43 = vpop.permute.xlu1 %313 }
 0x203   :  { %v322_v37 = vadd.f32 %v2571_v43, %v252_v11 }
 0x204   :  { %v2573_v40 = vpop.permute.xlu0 %346 }
 0x206   :  { %v2575_v58 = vpop.permute.xlu1 %344 }
 0x208   :  { %v378_v47 = vpop.permute.xlu0 %377 }
 0x209   :  { %v389_v32 = vadd.f32 %v378_v47, %v319_v15 }
 0x20a   :  { %v2581_v31 = vpop.permute.xlu1 %348 }
 0x20c   :  { %v382_v20 = vpop.permute.xlu0 %381 }
 0x20d   :  { %v391_v59 = vadd.f32 %v382_v20, %v321_v12  ;;  %v147_v20 = vadd.f32 %v1753_v26, %v140_v52 }
 0x20e   :  { %v380_v56 = vpop.permute.xlu1 %379 }
 0x20f   :  { %v390_v12 = vadd.f32 %v380_v56, %v320_v19  ;;  %v217_v43 = vadd.f32 %v2561_v34, %v147_v20 }
 0x210   :  { %v413_v21 = vpop.permute.xlu0 %412 }
 0x211   :  { %v424_v55 = vadd.f32 %v413_v21, %v354_v51 }
 0x212   :  { %v384_v44 = vpop.permute.xlu1 %383 }
 0x213   :  { %v392_v56 = vadd.f32 %v384_v44, %v322_v37 }
 0x214   :  { %v417_v17 = vpop.permute.xlu0 %416 }
 0x216   :  { %v415_v38 = vpop.permute.xlu1 %414 }
 0x218   :  { %v448_v14 = vpop.permute.xlu0 %447 }
 0x219   :  { %v459_v9 = vadd.f32 %v448_v14, %v389_v32  ;;  %v216_v14 = vadd.f32 %v2557_v61, %v146_v45  ;;  %v215_v61 = vadd.f32 %v2559_v54, %v145_v22  ;;  %v3441_v22 = vld [vmem:[#allocation6_spill] sm:$0xff] }
 0x21a   :  { %v419_v15 = vpop.permute.xlu1 %418 }
 0x21b   :  { %v2610_v23 = vmax.f32 %v459_v9, 0.0  ;;  %v286_v9 = vadd.f32 %v2565_v0, %v216_v14  ;;  %v285_v0 = vadd.f32 %v2567_v41, %v215_v61  ;;  %v3439_v14 = vld [vmem:[#allocation5_spill] sm:$0xff] }
 0x21c   :  { %v452_v62 = vpop.permute.xlu0 %451 }
 0x21d   :  { %v461_v53 = vadd.f32 %v452_v62, %v391_v59  ;;  %v580_v13 = vmul.f32 %v2341_v63, %v2610_v23  ;;  %v356_v47 = vadd.f32 %v2573_v40, %v286_v9  ;;  %v355_v40 = vadd.f32 %v2575_v58, %v285_v0  ;;  %v3446_v0 = vld [vmem:[#allocation13_spill] sm:$0xff] }
 0x21e   :  { %v450_v50 = vpop.permute.xlu1 %449  ;;  %v720_v51 = vmul.f32 %v3439_v14, %v2610_v23 }
 0x21f   :  { %v2619_v36 = vmax.f32 %v461_v53, 0.0  ;;  %588 = vrot.lane.b32.xlu0 %v580_v13, %s1961_s26  ;;  %v460_v29 = vadd.f32 %v450_v50, %v390_v12  ;;  %v426_v42 = vadd.f32 %v417_v17, %v356_v47  ;;  %v287_v17 = vadd.f32 %v2569_v39, %v217_v43  ;;  %v3440_v53 = vld [vmem:[#allocation7_spill] sm:$0xff]  ;;  %v3442_v12 = vld [vmem:[#allocation9_spill] sm:$0xff]  ;;  %v3445_v47 = vld [vmem:[#allocation10_spill] sm:$0xff] }
 0x220   :  { %v483_v57 = vpop.permute.xlu0 %482  ;;  %v425_v44 = vadd.f32 %v415_v38, %v355_v40 }
 0x221   :  { %v494_v48 = vadd.f32 %v483_v57, %v424_v55  ;;  %v582_v35 = vmul.f32 %v2341_v63, %v2619_v36  ;;  %v2628_v21 = vmax.f32 %v460_v29, 0.0  ;;  %v357_v58 = vadd.f32 %v2581_v31, %v287_v17  ;;  %v3443_v55 = vld [vmem:[#allocation8_spill] sm:$0xff]  ;;  %v3444_v29 = vld [vmem:[#allocation11_spill] sm:$0xff] }
 0x222   :  { %v454_v54 = vpop.permute.xlu1 %453  ;;  %v650_v31 = vmul.f32 %v2349_v3, %v2610_v23  ;;  %v792_v20 = vmul.f32 %v3445_v47, %v2619_v36 }
 0x223   :  { %3438 = vst [vmem:[#allocation35_spill] sm:$0xff] %v2628_v21  ;;  %v2630_v30 = vmax.f32 %v494_v48, 0.0  ;;  %592 = vrot.lane.b32.xlu0 %v582_v35, %s1961_s26  ;;  %v462_v46 = vadd.f32 %v454_v54, %v392_v56  ;;  %v581_v63 = vmul.f32 %v2347_v2, %v2628_v21  ;;  %v427_v39 = vadd.f32 %v419_v15, %v357_v58  ;;  %v3451_v58 = vld [vmem:[#allocation16_spill] sm:$0xff] }
 0x224   :  { %v487_v49 = vpop.permute.xlu0 %486  ;;  %v651_v59 = vmul.f32 %v2355_v6, %v2628_v21  ;;  %v721_v13 = vmul.f32 %v3440_v53, %v2628_v21  ;;  %v790_v48 = vmul.f32 %v3445_v47, %v2610_v23  ;;  %v791_v56 = vmul.f32 %v3446_v0, %v2628_v21 }
 0x225   :  { %v496_v27 = vadd.f32 %v487_v49, %v426_v42  ;;  %v923_v41 = vmul.f32 %v2345_v1, %v2630_v30  ;;  %v2640_v24 = vmax.f32 %v462_v46, 0.0  ;;  %590 = vrot.lane.b32.xlu1 %v581_v63, %s1961_s26  ;;  %v958_v15 = vmul.f32 %v2353_v5, %v2630_v30  ;;  %v3447_v42 = vld [vmem:[#allocation12_spill] sm:$0xff]  ;;  %v3448_v46 = vld [vmem:[#allocation15_spill] sm:$0xff]  ;;  %v3449_v63 = vld [vmem:[#allocation14_spill] sm:$0xff] }
 0x226   :  { %v485_v34 = vpop.permute.xlu1 %484  ;;  %v993_v19 = vmul.f32 %v2357_v7, %v2630_v30  ;;  %v1028_v52 = vmul.f32 %v3441_v22, %v2630_v30  ;;  %v1063_v50 = vmul.f32 %v3443_v55, %v2630_v30  ;;  %v1098_v54 = vmul.f32 %v3447_v42, %v2630_v30 }
 0x227   :  { %v2643_v28 = vmax.f32 %v496_v27, 0.0  ;;  %931 = vrot.lane.b32.xlu0 %v923_v41, %s1961_s26  ;;  %v495_v32 = vadd.f32 %v485_v34, %v425_v44  ;;  %v583_v33 = vmul.f32 %v2347_v2, %v2640_v24  ;;  %v652_v2 = vmul.f32 %v2349_v3, %v2619_v36  ;;  %v3450_v44 = vld [vmem:[#allocation17_spill] sm:$0xff] }
 0x228   :  { %v793_v43 = vmul.f32 %v3446_v0, %v2640_v24  ;;  %v1133_v27 = vmul.f32 %v3449_v63, %v2630_v30 }
 0x229   :  { %v925_v25 = vmul.f32 %v2345_v1, %v2643_v28  ;;  %v2651_v38 = vmax.f32 %v495_v32, 0.0  ;;  %594 = vrot.lane.b32.xlu1 %v583_v33, %s1961_s26  ;;  %v960_v3 = vmul.f32 %v2353_v5, %v2643_v28  ;;  %v995_v5 = vmul.f32 %v2357_v7, %v2643_v28 }
 0x22a   :  { %v489_v60 = vpop.permute.xlu1 %488  ;;  %v722_v7 = vmul.f32 %v3439_v14, %v2619_v36  ;;  %v1030_v11 = vmul.f32 %v3441_v22, %v2643_v28  ;;  %v1065_v37 = vmul.f32 %v3443_v55, %v2643_v28  ;;  %v1100_v40 = vmul.f32 %v3447_v42, %v2643_v28  ;;  %v3459_v22 = vld [vmem:[#allocation24_spill] sm:$0xff] }
 0x22b   :  { %935 = vrot.lane.b32.xlu0 %v925_v25, %s1961_s26  ;;  %v497_v45 = vadd.f32 %v489_v60, %v427_v39  ;;  %v924_v26 = vmul.f32 %v2351_v4, %v2651_v38  ;;  %v959_v16 = vmul.f32 %v2359_v8, %v2651_v38  ;;  %v994_v62 = vmul.f32 %v2363_v10, %v2651_v38  ;;  %v3452_v39 = vld [vmem:[#allocation19_spill] sm:$0xff] }
 0x22c   :  { %v1029_v9 = vmul.f32 %v3442_v12, %v2651_v38  ;;  %v1064_v57 = vmul.f32 %v3444_v29, %v2651_v38  ;;  %v1099_v49 = vmul.f32 %v3448_v46, %v2651_v38  ;;  %v1135_v17 = vmul.f32 %v3449_v63, %v2643_v28 }
 0x22d   :  { %v2659_v18 = vmax.f32 %v497_v45, 0.0  ;;  %933 = vrot.lane.b32.xlu1 %v924_v26, %s1961_s26  ;;  %v1134_v34 = vmul.f32 %v3450_v44, %v2651_v38  ;;  %v860_v32 = vmul.f32 %v3451_v58, %v2610_v23  ;;  %v862_v25 = vmul.f32 %v3451_v58, %v2619_v36  ;;  %v3453_v45 = vld [vmem:[#allocation18_spill] sm:$0xff] }
 0x22e   :  { %v861_v60 = vmul.f32 %v3452_v39, %v2628_v21  ;;  %v1168_v26 = vmul.f32 %v3453_v45, %v2630_v30  ;;  %v3465_v58 = vld [vmem:[#allocation30_spill] sm:$0xff] }
 0x22f   :  { %658 = vrot.lane.b32.xlu0 %v650_v31, %s1962_s7  ;;  %v926_v1 = vmul.f32 %v2351_v4, %v2659_v18  ;;  %v653_v4 = vmul.f32 %v2355_v6, %v2640_v24  ;;  %v961_v6 = vmul.f32 %v2359_v8, %v2659_v18  ;;  %v996_v8 = vmul.f32 %v2363_v10, %v2659_v18 }
 0x230   :  { %v723_v10 = vmul.f32 %v3440_v53, %v2640_v24  ;;  %v1031_v61 = vmul.f32 %v3442_v12, %v2659_v18  ;;  %v1066_v35 = vmul.f32 %v3444_v29, %v2659_v18  ;;  %v1101_v41 = vmul.f32 %v3448_v46, %v2659_v18  ;;  %v3461_v29 = vld [vmem:[#allocation26_spill] sm:$0xff] }
 0x231   :  { %937 = vrot.lane.b32.xlu1 %v926_v1, %s1961_s26  ;;  %v1136_v33 = vmul.f32 %v3450_v44, %v2659_v18  ;;  %v863_v31 = vmul.f32 %v3452_v39, %v2640_v24  ;;  %v1170_v1 = vmul.f32 %v3453_v45, %v2643_v28 }
 0x233   :  { %662 = vrot.lane.b32.xlu0 %v652_v2, %s1962_s7  ;;  %v3454_v2 = vld [vmem:[#allocation21_spill] sm:$0xff] }
 0x235   :  { %660 = vrot.lane.b32.xlu1 %v651_v59, %s1962_s7  ;;  %v1169_v59 = vmul.f32 %v3454_v2, %v2651_v38 }
 0x237   :  { %966 = vrot.lane.b32.xlu0 %v958_v15, %s1961_s26  ;;  %v3455_v15 = vld [vmem:[#allocation20_spill] sm:$0xff] }
 0x239   :  { %664 = vrot.lane.b32.xlu1 %v653_v4, %s1962_s7  ;;  %v1203_v4 = vmul.f32 %v3455_v15, %v2630_v30 }
 0x23b   :  { %970 = vrot.lane.b32.xlu0 %v960_v3, %s1961_s26  ;;  %v1171_v3 = vmul.f32 %v3454_v2, %v2659_v18  ;;  %v3467_v2 = vld [vmem:[#allocation32_spill] sm:$0xff] }
 0x23d   :  { %968 = vrot.lane.b32.xlu1 %v959_v16, %s1961_s26  ;;  %v1205_v16 = vmul.f32 %v3455_v15, %v2643_v28 }
 0x23f   :  { %1001 = vrot.lane.b32.xlu0 %v993_v19, %s1962_s7  ;;  %v3456_v19 = vld [vmem:[#allocation23_spill] sm:$0xff] }
 0x240   :  { %v1206_v14 = vmul.f32 %v3456_v19, %v2659_v18 }
 0x241   :  { %972 = vrot.lane.b32.xlu1 %v961_v6, %s1961_s26  ;;  %v1204_v6 = vmul.f32 %v3456_v19, %v2651_v38 }
 0x243   :  { %1005 = vrot.lane.b32.xlu0 %v995_v5, %s1962_s7  ;;  %v3457_v5 = vld [vmem:[#allocation22_spill] sm:$0xff] }
 0x245   :  { %1003 = vrot.lane.b32.xlu1 %v994_v62, %s1962_s7  ;;  %v1238_v62 = vmul.f32 %v3457_v5, %v2630_v30 }
 0x247   :  { %728 = vrot.lane.b32.xlu0 %v720_v51, %s1963_s16 }
 0x249   :  { %1007 = vrot.lane.b32.xlu1 %v996_v8, %s1962_s7  ;;  %v1240_v8 = vmul.f32 %v3457_v5, %v2643_v28 }
 0x24b   :  { %732 = vrot.lane.b32.xlu0 %v722_v7, %s1963_s16  ;;  %v3458_v7 = vld [vmem:[#allocation25_spill] sm:$0xff] }
 0x24c   :  { %v1239_v53 = vmul.f32 %v3458_v7, %v2651_v38 }
 0x24d   :  { %730 = vrot.lane.b32.xlu1 %v721_v13, %s1963_s16 }
 0x24f   :  { %1036 = vrot.lane.b32.xlu0 %v1028_v52, %s1962_s7  ;;  %v545_v52 = vmul.f32 %v3459_v22, %v2610_v23 }
 0x251   :  { %734 = vrot.lane.b32.xlu1 %v723_v10, %s1963_s16 }
 0x253   :  { %1040 = vrot.lane.b32.xlu0 %v1030_v11, %s1962_s7  ;;  %v1241_v11 = vmul.f32 %v3458_v7, %v2659_v18 }
 0x255   :  { %1038 = vrot.lane.b32.xlu1 %v1029_v9, %s1962_s7  ;;  %v547_v9 = vmul.f32 %v3459_v22, %v2619_v36 }
 0x257   :  { %1071 = vrot.lane.b32.xlu0 %v1063_v50, %s1963_s16  ;;  %v3460_v50 = vld [vmem:[#allocation27_spill] sm:$0xff] }
 0x259   :  { %1042 = vrot.lane.b32.xlu1 %v1031_v61, %s1962_s7  ;;  %v546_v61 = vmul.f32 %v3460_v50, %v2628_v21 }
 0x25b   :  { %1075 = vrot.lane.b32.xlu0 %v1065_v37, %s1963_s16 }
 0x25d   :  { %1073 = vrot.lane.b32.xlu1 %v1064_v57, %s1963_s16  ;;  %v615_v57 = vmul.f32 %v3461_v29, %v2610_v23 }
 0x25f   :  { %798 = vrot.lane.b32.xlu0 %v790_v48, %s1964_s29  ;;  %v548_v48 = vmul.f32 %v3460_v50, %v2640_v24 }
 0x261   :  { %1077 = vrot.lane.b32.xlu1 %v1066_v35, %s1963_s16 }
 0x263   :  { %802 = vrot.lane.b32.xlu0 %v792_v20, %s1964_s29  ;;  %v617_v20 = vmul.f32 %v3461_v29, %v2619_v36 }
 0x265   :  { %800 = vrot.lane.b32.xlu1 %v791_v56, %s1964_s29  ;;  %v3462_v56 = vld [vmem:[#allocation29_spill] sm:$0xff] }
 0x266   :  { %v616_v42 = vmul.f32 %v3462_v56, %v2628_v21 }
 0x267   :  { %1106 = vrot.lane.b32.xlu0 %v1098_v54, %s1963_s16 }
 0x269   :  { %804 = vrot.lane.b32.xlu1 %v793_v43, %s1964_s29  ;;  %v3463_v43 = vld [vmem:[#allocation28_spill] sm:$0xff] }
 0x26b   :  { %1110 = vrot.lane.b32.xlu0 %v1100_v40, %s1963_s16  ;;  %v685_v40 = vmul.f32 %v3463_v43, %v2610_v23 }
 0x26d   :  { %1108 = vrot.lane.b32.xlu1 %v1099_v49, %s1963_s16  ;;  %v618_v49 = vmul.f32 %v3462_v56, %v2640_v24  ;;  %v1778_v56 = vld [vmem:[%s3375_s1 + $0x140] sm:$0xff] }
 0x26f   :  { %1141 = vrot.lane.b32.xlu0 %v1133_v27, %s1964_s29  ;;  %v687_v27 = vmul.f32 %v3463_v43, %v2619_v36  ;;  %v523_v43 = vmul.f32 %v1778_v56, %v2610_v23 }
 0x271   :  { %1112 = vrot.lane.b32.xlu1 %v1101_v41, %s1963_s16 }
 0x273   :  { %1145 = vrot.lane.b32.xlu0 %v1135_v17, %s1964_s29  ;;  %v3464_v17 = vld [vmem:[#allocation31_spill] sm:$0xff] }
 0x274   :  { %v686_v44 = vmul.f32 %v3464_v17, %v2628_v21 }
 0x275   :  { %1143 = vrot.lane.b32.xlu1 %v1134_v34, %s1964_s29 }
 0x277   :  { %868 = vrot.lane.b32.xlu0 %v860_v32, %s1965_s30  ;;  %v755_v32 = vmul.f32 %v3465_v58, %v2610_v23 }
 0x279   :  { %1147 = vrot.lane.b32.xlu1 %v1136_v33, %s1964_s29 }
 0x27b   :  { %872 = vrot.lane.b32.xlu0 %v862_v25, %s1965_s30  ;;  %v688_v25 = vmul.f32 %v3464_v17, %v2640_v24 }
 0x27d   :  { %870 = vrot.lane.b32.xlu1 %v861_v60, %s1965_s30  ;;  %v757_v60 = vmul.f32 %v3465_v58, %v2619_v36  ;;  %v1779_v58 = vld [vmem:[%s3375_s1 + $0x148] sm:$0xff] }
 0x27f   :  { %1176 = vrot.lane.b32.xlu0 %v1168_v26, %s1964_s29  ;;  %v3466_v26 = vld [vmem:[#allocation33_spill] sm:$0xff] }
 0x281   :  { %874 = vrot.lane.b32.xlu1 %v863_v31, %s1965_s30  ;;  %v756_v31 = vmul.f32 %v3466_v26, %v2628_v21 }
 0x283   :  { %1180 = vrot.lane.b32.xlu0 %v1170_v1, %s1964_s29 }
 0x285   :  { %1178 = vrot.lane.b32.xlu1 %v1169_v59, %s1964_s29  ;;  %v825_v59 = vmul.f32 %v3467_v2, %v2610_v23 }
 0x287   :  { %1211 = vrot.lane.b32.xlu0 %v1203_v4, %s1965_s30  ;;  %v758_v4 = vmul.f32 %v3466_v26, %v2640_v24  ;;  %v524_v26 = vmul.f32 %v1779_v58, %v2628_v21 }
 0x289   :  { %1182 = vrot.lane.b32.xlu1 %v1171_v3, %s1964_s29 }
 0x28b   :  { %1215 = vrot.lane.b32.xlu0 %v1205_v16, %s1965_s30  ;;  %v827_v16 = vmul.f32 %v3467_v2, %v2619_v36  ;;  %v1781_v2 = vld [vmem:[%s3375_s1 + $0x278] sm:$0xff] }
 0x28d   :  { %1213 = vrot.lane.b32.xlu1 %v1204_v6, %s1965_s30  ;;  %v3468_v6 = vld [vmem:[#allocation34_spill] sm:$0xff] }
 0x28e   :  { %v826_v5 = vmul.f32 %v3468_v6, %v2628_v21 }
 0x28f   :  { %1246 = vrot.lane.b32.xlu0 %v1238_v62, %s1965_s30 }
 0x291   :  { %v2809_v51 = vpop.permute.xlu0 %588  ;;  %1217 = vrot.lane.b32.xlu1 %v1206_v14, %s1965_s30 }
 0x293   :  { %1250 = vrot.lane.b32.xlu0 %v1240_v8, %s1965_s30  ;;  %v828_v8 = vmul.f32 %v3468_v6, %v2640_v24 }
 0x295   :  { %v2817_v13 = vpop.permute.xlu0 %592  ;;  %1248 = vrot.lane.b32.xlu1 %v1239_v53, %s1965_s30 }
 0x297   :  { %553 = vrot.lane.b32.xlu0 %v545_v52, %s1961_s26  ;;  %v2823_v10 = vpop.permute.xlu1 %590 }
 0x299   :  { %v2827_v12 = vpop.permute.xlu0 %931  ;;  %1252 = vrot.lane.b32.xlu1 %v1241_v11, %s1965_s30 }
 0x29b   :  { %557 = vrot.lane.b32.xlu0 %v547_v9, %s1961_s26  ;;  %v2833_v55 = vpop.permute.xlu1 %594 }
 0x29d   :  { %v2837_v37 = vpop.permute.xlu0 %935  ;;  %555 = vrot.lane.b32.xlu1 %v546_v61, %s1961_s26 }
 0x29f   :  { %623 = vrot.lane.b32.xlu0 %v615_v57, %s1962_s7  ;;  %v2843_v47 = vpop.permute.xlu1 %933 }
 0x2a1   :  { %v2847_v35 = vpop.permute.xlu0 %658  ;;  %559 = vrot.lane.b32.xlu1 %v548_v48, %s1961_s26 }
 0x2a3   :  { %627 = vrot.lane.b32.xlu0 %v617_v20, %s1962_s7  ;;  %v2853_v0 = vpop.permute.xlu1 %937 }
 0x2a5   :  { %v2857_v54 = vpop.permute.xlu0 %662  ;;  %625 = vrot.lane.b32.xlu1 %v616_v42, %s1962_s7 }
 0x2a7   :  { %693 = vrot.lane.b32.xlu0 %v685_v40, %s1963_s16  ;;  %v2863_v46 = vpop.permute.xlu1 %660 }
 0x2a9   :  { %v2867_v63 = vpop.permute.xlu0 %966  ;;  %629 = vrot.lane.b32.xlu1 %v618_v49, %s1962_s7  ;;  %v1780_v49 = vld [vmem:[%s3375_s1 + $0x270] sm:$0xff] }
 0x2aa   :  { %v530_v17 = vadd.f32 %v1780_v49, %v523_v43 }
 0x2ab   :  { %697 = vrot.lane.b32.xlu0 %v687_v27, %s1963_s16  ;;  %v2873_v41 = vpop.permute.xlu1 %664 }
 0x2ad   :  { %v2877_v34 = vpop.permute.xlu0 %970  ;;  %695 = vrot.lane.b32.xlu1 %v686_v44, %s1963_s16  ;;  %v525_v44 = vmul.f32 %v1778_v56, %v2619_v36  ;;  %v526_v56 = vmul.f32 %v1779_v58, %v2640_v24 }
 0x2af   :  { %763 = vrot.lane.b32.xlu0 %v755_v32, %s1964_s29  ;;  %v2883_v33 = vpop.permute.xlu1 %968 }
 0x2b1   :  { %v2887_v39 = vpop.permute.xlu0 %1001  ;;  %699 = vrot.lane.b32.xlu1 %v688_v25, %s1963_s16 }
 0x2b3   :  { %767 = vrot.lane.b32.xlu0 %v757_v60, %s1964_s29  ;;  %v2893_v45 = vpop.permute.xlu1 %972  ;;  %v600_v60 = vadd.f32 %v2809_v51, %v530_v17 }
 0x2b5   :  { %v2897_v1 = vpop.permute.xlu0 %1005  ;;  %765 = vrot.lane.b32.xlu1 %v756_v31, %s1964_s29  ;;  %v532_v31 = vadd.f32 %v1780_v49, %v525_v44 }
 0x2b7   :  { %833 = vrot.lane.b32.xlu0 %v825_v59, %s1965_s30  ;;  %v2903_v15 = vpop.permute.xlu1 %1003  ;;  %v670_v59 = vadd.f32 %v2847_v35, %v600_v60  ;;  %v602_v6 = vadd.f32 %v2817_v13, %v532_v31  ;;  %v1802_v35 = vld [vmem:[%s3375_s1 + $0x1a0] sm:$0xff]  ;;  %v533_v13 = vadd.f32 %v1781_v2, %v526_v56  ;;  %v1803_v56 = vld [vmem:[%s3375_s1 + $0x1a8] sm:$0xff] }
 0x2b8   :  { %v887_v58 = vmul.f32 %v1802_v35, %v2630_v30 }
 0x2b9   :  { %v729_v3 = vpop.permute.xlu0 %728  ;;  %769 = vrot.lane.b32.xlu1 %v758_v4, %s1964_s29  ;;  %v672_v51 = vadd.f32 %v2857_v54, %v602_v6  ;;  %v603_v31 = vadd.f32 %v2833_v55, %v533_v13 }
 0x2bb   :  { %837 = vrot.lane.b32.xlu0 %v827_v16, %s1965_s30  ;;  %v2911_v19 = vpop.permute.xlu1 %1007 }
 0x2bd   :  { %v733_v62 = vpop.permute.xlu0 %732  ;;  %835 = vrot.lane.b32.xlu1 %v826_v5, %s1965_s30  ;;  %v740_v5 = vadd.f32 %v729_v3, %v670_v59 }
 0x2be   :  { %v742_v60 = vadd.f32 %v733_v62, %v672_v51  ;;  %v1806_v51 = vld [vmem:[%s3375_s1 + $0x200] sm:$0xff] }
 0x2bf   :  { %v731_v14 = vpop.permute.xlu1 %730 }
 0x2c1   :  { %v2918_v7 = vpop.permute.xlu0 %1036  ;;  %839 = vrot.lane.b32.xlu1 %v828_v8, %s1965_s30  ;;  %v531_v8 = vadd.f32 %v1781_v2, %v524_v26 }
 0x2c3   :  { %v2921_v53 = vpop.permute.xlu1 %734  ;;  %v601_v17 = vadd.f32 %v2823_v10, %v531_v8  ;;  %v1804_v10 = vld [vmem:[%s3375_s1 + $0x280] sm:$0xff]  ;;  %v889_v8 = vmul.f32 %v1802_v35, %v2643_v28 }
 0x2c5   :  { %v2923_v22 = vpop.permute.xlu0 %1040  ;;  %v671_v3 = vadd.f32 %v2863_v46, %v601_v17 }
 0x2c7   :  { %v2925_v52 = vpop.permute.xlu1 %1038  ;;  %v741_v62 = vadd.f32 %v731_v14, %v671_v3  ;;  %v896_v3 = vadd.f32 %v1804_v10, %v889_v8  ;;  %v1807_v8 = vld [vmem:[%s3375_s1 + $0x208] sm:$0xff] }
 0x2c9   :  { %v2927_v11 = vpop.permute.xlu0 %1071 }
 0x2cb   :  { %v2929_v9 = vpop.permute.xlu1 %1042 }
 0x2cd   :  { %v2931_v50 = vpop.permute.xlu0 %1075 }
 0x2cf   :  { %v2933_v61 = vpop.permute.xlu1 %1073 }
 0x2d1   :  { %v799_v29 = vpop.permute.xlu0 %798 }
 0x2d2   :  { %v810_v43 = vadd.f32 %v799_v29, %v740_v5  ;;  %v894_v5 = vadd.f32 %v1804_v10, %v887_v58  ;;  %v901_v58 = vmul.f32 %v1806_v51, %v2630_v30 }
 0x2d3   :  { %v2935_v57 = vpop.permute.xlu1 %1077 }
 0x2d5   :  { %v803_v48 = vpop.permute.xlu0 %802 }
 0x2d6   :  { %v812_v54 = vadd.f32 %v803_v48, %v742_v60  ;;  %v673_v48 = vadd.f32 %v2873_v41, %v603_v31  ;;  %v1808_v31 = vld [vmem:[%s3375_s1 + $0x290] sm:$0xff] }
 0x2d7   :  { %v801_v20 = vpop.permute.xlu1 %800 }
 0x2d8   :  { %v811_v2 = vadd.f32 %v801_v20, %v741_v62  ;;  %v943_v20 = vadd.f32 %v2827_v12, %v894_v5  ;;  %v903_v5 = vmul.f32 %v1806_v51, %v2643_v28 }
 0x2d9   :  { %v2940_v42 = vpop.permute.xlu0 %1106 }
 0x2db   :  { %v805_v40 = vpop.permute.xlu1 %804 }
 0x2dd   :  { %v2946_v27 = vpop.permute.xlu0 %1110 }
 0x2df   :  { %v2952_v32 = vpop.permute.xlu1 %1108 }
 0x2e1   :  { %v2954_v25 = vpop.permute.xlu0 %1141 }
 0x2e3   :  { %v2962_v4 = vpop.permute.xlu1 %1112 }
 0x2e5   :  { %v2964_v16 = vpop.permute.xlu0 %1145 }
 0x2e7   :  { %v2969_v49 = vpop.permute.xlu1 %1143 }
 0x2e9   :  { %v869_v44 = vpop.permute.xlu0 %868 }
 0x2ea   :  { %v2975_v21 = vadd.f32 %v869_v44, %v810_v43  ;;  %v743_v43 = vadd.f32 %v2921_v53, %v673_v48  ;;  %v888_v44 = vmul.f32 %v1803_v56, %v2651_v38  ;;  %v1805_v53 = vld [vmem:[%s3375_s1 + $0x288] sm:$0xff] }
 0x2eb   :  { %v2980_v26 = vpop.permute.xlu1 %1147 }
 0x2ec   :  { %v1266_v29 = vmax.f32 %v2975_v21, 0.0  ;;  %v813_v60 = vadd.f32 %v805_v40, %v743_v43  ;;  %v895_v30 = vadd.f32 %v1805_v53, %v888_v44 }
 0x2ed   :  { %v873_v59 = vpop.permute.xlu0 %872 }
 0x2ee   :  { %v2986_v6 = vadd.f32 %v873_v59, %v812_v54  ;;  %v1363_v46 = vsel %vm1278_vm9, %v1266_v29, 0.0  ;;  %v1013_v54 = vadd.f32 %v2887_v39, %v943_v20  ;;  %v945_v59 = vadd.f32 %v2837_v37, %v896_v3 }
 0x2ef   :  { %1364 = vadd.xlane.f32.xlu0 %v1363_v46  ;;  %v871_v14 = vpop.permute.xlu1 %870  ;;  %v890_v39 = vmul.f32 %v1803_v56, %v2659_v18 }
 0x2f0   :  { %v1268_v55 = vmax.f32 %v2986_v6, 0.0  ;;  %v3001_v17 = vadd.f32 %v871_v14, %v811_v2  ;;  %v1083_v46 = vadd.f32 %v2927_v11, %v1013_v54  ;;  %v908_v2 = vadd.f32 %v1808_v31, %v901_v58 }
 0x2f1   :  { %v1177_v41 = vpop.permute.xlu0 %1176  ;;  %v1015_v14 = vadd.f32 %v2897_v1, %v945_v59  ;;  %v944_v11 = vadd.f32 %v2843_v47, %v895_v30  ;;  %v897_v44 = vadd.f32 %v1805_v53, %v890_v39  ;;  %v902_v1 = vmul.f32 %v1807_v8, %v2651_v38  ;;  %v1809_v47 = vld [vmem:[%s3375_s1 + $0x298] sm:$0xff] }
 0x2f2   :  { %v1369_v35 = vsel %vm1278_vm9, %v1268_v55, 0.0  ;;  %v1267_v13 = vmax.f32 %v3001_v17, 0.0  ;;  %v1153_v43 = vadd.f32 %v2954_v25, %v1083_v46 }
 0x2f3   :  { %1370 = vadd.xlane.f32.xlu0 %v1369_v35  ;;  %v875_v12 = vpop.permute.xlu1 %874  ;;  %v978_v35 = vadd.f32 %v2867_v63, %v908_v2  ;;  %v1085_v28 = vadd.f32 %v2931_v50, %v1015_v14  ;;  %v1014_v25 = vadd.f32 %v2903_v15, %v944_v11  ;;  %v946_v54 = vadd.f32 %v2853_v0, %v897_v44 }
 0x2f4   :  { %v3017_v62 = vadd.f32 %v875_v12, %v813_v60  ;;  %v1366_v10 = vsel %vm1278_vm9, %v1267_v13, 0.0  ;;  %v910_v60 = vadd.f32 %v1808_v31, %v903_v5 }
 0x2f5   :  { %v1181_v40 = vpop.permute.xlu0 %1180  ;;  %1367 = vadd.xlane.f32.xlu1 %v1366_v10  ;;  %v1048_v3 = vadd.f32 %v2918_v7, %v978_v35  ;;  %v1155_v58 = vadd.f32 %v2964_v16, %v1085_v28  ;;  %v1084_v53 = vadd.f32 %v2933_v61, %v1014_v25  ;;  %v909_v10 = vadd.f32 %v1809_v47, %v902_v1 }
 0x2f6   :  { %v1269_v48 = vmax.f32 %v3017_v62, 0.0  ;;  %v980_v38 = vadd.f32 %v2877_v34, %v910_v60  ;;  %v904_v16 = vmul.f32 %v1807_v8, %v2659_v18  ;;  %v1016_v59 = vadd.f32 %v2911_v19, %v946_v54 }
 0x2f7   :  { %v1179_v37 = vpop.permute.xlu1 %1178  ;;  %v1118_v15 = vadd.f32 %v2940_v42, %v1048_v3  ;;  %v1154_v0 = vadd.f32 %v2969_v49, %v1084_v53  ;;  %v979_v30 = vadd.f32 %v2883_v33, %v909_v10 }
 0x2f8   :  { %v1372_v56 = vsel %vm1278_vm9, %v1269_v48, 0.0  ;;  %v1050_v61 = vadd.f32 %v2923_v22, %v980_v38  ;;  %v1086_v39 = vadd.f32 %v2935_v57, %v1016_v59  ;;  %v911_v22 = vadd.f32 %v1809_v47, %v904_v16  ;;  %v1774_v59 = vld [vmem:[%s3375_s1 + $0xe0] sm:$0xff] }
 0x2f9   :  { %v1212_v20 = vpop.permute.xlu0 %1211  ;;  %1373 = vadd.xlane.f32.xlu0 %v1372_v56  ;;  %v1188_v46 = vadd.f32 %v1177_v41, %v1118_v15  ;;  %v1049_v49 = vadd.f32 %v2925_v52, %v979_v30 }
 0x2fa   :  { %v3038_v51 = vadd.f32 %v1212_v20, %v1153_v43  ;;  %v1120_v18 = vadd.f32 %v2946_v27, %v1050_v61  ;;  %v1156_v41 = vadd.f32 %v2980_v26, %v1086_v39  ;;  %v981_v27 = vadd.f32 %v2893_v45, %v911_v22 }
 0x2fb   :  { %v1183_v50 = vpop.permute.xlu1 %1182  ;;  %v1119_v11 = vadd.f32 %v2952_v32, %v1049_v49  ;;  %v509_v61 = vmul.f32 %v1774_v59, %v2610_v23  ;;  %v1777_v23 = vld [vmem:[%s3375_s1 + $0x268] sm:$0xff] }
 0x2fc   :  { %v1270_v63 = vmax.f32 %v3038_v51, 0.0  ;;  %v1190_v57 = vadd.f32 %v1181_v40, %v1120_v18  ;;  %v1051_v40 = vadd.f32 %v2929_v9, %v981_v27  ;;  %v1775_v18 = vld [vmem:[%s3375_s1 + $0xe8] sm:$0xff] }
 0x2fd   :  { %v1216_v12 = vpop.permute.xlu0 %1215  ;;  %v1189_v28 = vadd.f32 %v1179_v37, %v1119_v11 }
 0x2fe   :  { %v3052_v31 = vadd.f32 %v1216_v12, %v1155_v58  ;;  %v1447_v7 = vsel %vm1278_vm9, %v1270_v63, 0.0  ;;  %v1121_v1 = vadd.f32 %v2962_v4, %v1051_v40  ;;  %v512_v40 = vmul.f32 %v1775_v18, %v2640_v24 }
 0x2ff   :  { %1448 = vadd.xlane.f32.xlu0 %v1447_v7  ;;  %v1214_v42 = vpop.permute.xlu1 %1213 }
 0x300   :  { %v1272_v34 = vmax.f32 %v3052_v31, 0.0  ;;  %v3064_v2 = vadd.f32 %v1214_v42, %v1154_v0  ;;  %v1191_v37 = vadd.f32 %v1183_v50, %v1121_v1  ;;  %v1776_v42 = vld [vmem:[%s3375_s1 + $0x260] sm:$0xff]  ;;  %s1966_s1 = smov 11  }
 0x301   :  { %v1247_v5 = vpop.permute.xlu0 %1246  ;;  %v516_v39 = vadd.f32 %v1776_v42, %v509_v61 }
 0x302   :  { %v3067_v8 = vadd.f32 %v1247_v5, %v1188_v46  ;;  %v1453_v19 = vsel %vm1278_vm9, %v1272_v34, 0.0  ;;  %v1271_v33 = vmax.f32 %v3064_v2, 0.0  ;;  %v511_v5 = vmul.f32 %v1774_v59, %v2619_v36 }
 0x303   :  { %1454 = vadd.xlane.f32.xlu0 %v1453_v19  ;;  %v1218_v43 = vpop.permute.xlu1 %1217 }
 0x304   :  { %v1274_v14 = vmax.f32 %v3067_v8, 0.0  ;;  %v3078_v20 = vadd.f32 %v1218_v43, %v1156_v41  ;;  %v1450_v52 = vsel %vm1278_vm9, %v1271_v33, 0.0  ;;  %v3469_v41 = vld [vmem:[#allocation35_spill] sm:$0xff]  ;;  %v518_v43 = vadd.f32 %v1776_v42, %v511_v5 }
 0x305   :  { %v1251_v56 = vpop.permute.xlu0 %1250  ;;  %1451 = vadd.xlane.f32.xlu1 %v1450_v52 }
 0x306   :  { %v3083_v35 = vadd.f32 %v1251_v56, %v1190_v57  ;;  %v1531_v26 = vsel %vm1278_vm9, %v1274_v14, 0.0  ;;  %v1273_v45 = vmax.f32 %v3078_v20, 0.0  ;;  %v510_v57 = vmul.f32 %v1775_v18, %v3469_v41 }
 0x307   :  { %1532 = vadd.xlane.f32.xlu0 %v1531_v26  ;;  %v1249_v44 = vpop.permute.xlu1 %1248 }
 0x308   :  { %v1276_v32 = vmax.f32 %v3083_v35, 0.0  ;;  %v3092_v25 = vadd.f32 %v1249_v44, %v1189_v28  ;;  %v1456_v47 = vsel %vm1278_vm9, %v1273_v45, 0.0  ;;  %v517_v36 = vadd.f32 %v1777_v23, %v510_v57 }
 0x309   :  { %v554_v60 = vpop.permute.xlu0 %553  ;;  %1457 = vadd.xlane.f32.xlu1 %v1456_v47 }
 0x30a   :  { %v1537_v9 = vsel %vm1278_vm9, %v1276_v32, 0.0  ;;  %v1275_v3 = vmax.f32 %v3092_v25, 0.0  ;;  %v565_v49 = vadd.f32 %v554_v60, %v516_v39 }
 0x30b   :  { %1538 = vadd.xlane.f32.xlu0 %v1537_v9  ;;  %v1253_v58 = vpop.permute.xlu1 %1252 }
 0x30c   :  { %v3101_v54 = vadd.f32 %v1253_v58, %v1191_v37  ;;  %v1534_v53 = vsel %vm1278_vm9, %v1275_v3, 0.0  ;;  %v519_v58 = vadd.f32 %v1777_v23, %v512_v40 }
 0x30d   :  { %v558_v4 = vpop.permute.xlu0 %557  ;;  %1535 = vadd.xlane.f32.xlu1 %v1534_v53 }
 0x30e   :  { %v1277_v12 = vmax.f32 %v3101_v54, 0.0  ;;  %v567_v52 = vadd.f32 %v558_v4, %v518_v43 }
 0x30f   :  { %v556_v38 = vpop.permute.xlu1 %555 }
 0x310   :  { %v1540_v50 = vsel %vm1278_vm9, %v1277_v12, 0.0  ;;  %v566_v47 = vadd.f32 %v556_v38, %v517_v36 }
 0x311   :  { %v624_v15 = vpop.permute.xlu0 %623  ;;  %1541 = vadd.xlane.f32.xlu1 %v1540_v50 }
 0x312   :  { %v635_v27 = vadd.f32 %v624_v15, %v565_v49 }
 0x313   :  { %v560_v7 = vpop.permute.xlu1 %559 }
 0x314   :  { %v568_v61 = vadd.f32 %v560_v7, %v519_v58 }
 0x315   :  { %v628_v10 = vpop.permute.xlu0 %627 }
 0x316   :  { %v637_v28 = vadd.f32 %v628_v10, %v567_v52 }
 0x317   :  { %v626_v16 = vpop.permute.xlu1 %625 }
 0x318   :  { %v636_v53 = vadd.f32 %v626_v16, %v566_v47 }
 0x319   :  { %v694_v0 = vpop.permute.xlu0 %693 }
 0x31a   :  { %v705_v26 = vadd.f32 %v694_v0, %v635_v27 }
 0x31b   :  { %v630_v46 = vpop.permute.xlu1 %629 }
 0x31c   :  { %v638_v38 = vadd.f32 %v630_v46, %v568_v61 }
 0x31d   :  { %v698_v30 = vpop.permute.xlu0 %697 }
 0x31e   :  { %v707_v9 = vadd.f32 %v698_v30, %v637_v28 }
 0x31f   :  { %v696_v19 = vpop.permute.xlu1 %695 }
 0x320   :  { %v706_v4 = vadd.f32 %v696_v19, %v636_v53 }
 0x321   :  { %v764_v22 = vpop.permute.xlu0 %763 }
 0x322   :  { %v775_v44 = vadd.f32 %v764_v22, %v705_v26 }
 0x323   :  { %v700_v11 = vpop.permute.xlu1 %699 }
 0x324   :  { %v708_v16 = vadd.f32 %v700_v11, %v638_v38 }
 0x325   :  { %v768_v56 = vpop.permute.xlu0 %767 }
 0x326   :  { %v777_v50 = vadd.f32 %v768_v56, %v707_v9 }
 0x327   :  { %v766_v1 = vpop.permute.xlu1 %765 }
 0x328   :  { %v776_v10 = vadd.f32 %v766_v1, %v706_v4 }
 0x329   :  { %v834_v60 = vpop.permute.xlu0 %833 }
 0x32a   :  { %v3126_v37 = vadd.f32 %v834_v60, %v775_v44 }
 0x32b   :  { %v770_v59 = vpop.permute.xlu1 %769 }
 0x32c   :  { %v1262_v15 = vmax.f32 %v3126_v37, 0.0  ;;  %v778_v18 = vadd.f32 %v770_v59, %v708_v16 }
 0x32d   :  { %v838_v0 = vpop.permute.xlu0 %837 }
 0x32e   :  { %v3129_v42 = vadd.f32 %v838_v0, %v777_v50  ;;  %v1279_v24 = vsel %vm1278_vm9, %v1262_v15, 0.0 }
 0x32f   :  { %1280 = vadd.xlane.f32.xlu0 %v1279_v24  ;;  %v836_v39 = vpop.permute.xlu1 %835 }
 0x330   :  { %v1264_v30 = vmax.f32 %v3129_v42, 0.0  ;;  %v3135_v5 = vadd.f32 %v836_v39, %v776_v10 }
 0x332   :  { %v1285_v7 = vsel %vm1278_vm9, %v1264_v30, 0.0  ;;  %v1263_v19 = vmax.f32 %v3135_v5, 0.0 }
 0x333   :  { %1286 = vadd.xlane.f32.xlu0 %v1285_v7  ;;  %v840_v22 = vpop.permute.xlu1 %839 }
 0x334   :  { %v3141_v49 = vadd.f32 %v840_v22, %v778_v18  ;;  %v1282_v46 = vsel %vm1278_vm9, %v1263_v19, 0.0 }
 0x335   :  { %1283 = vadd.xlane.f32.xlu1 %v1282_v46 }
 0x336   :  { %v1265_v41 = vmax.f32 %v3141_v49, 0.0 }
 0x338   :  { %v1288_v57 = vsel %vm1278_vm9, %v1265_v41, 0.0 }
 0x339   :  { %1289 = vadd.xlane.f32.xlu1 %v1288_v57 }
 0x378   :  { %v1365_v43 = vpop.xlane.xlu0 %1364 }
 0x379   :  { %v1375_v23 = vmul.f32 0.09090909, %v1365_v43 }
 0x37b   :  { %v3152_v27 = vsub.f32 %v1266_v29, %v1375_v23 }
 0x37c   :  { %v1371_v11 = vpop.xlane.xlu0 %1370 }
 0x37d   :  { %v1377_v56 = vmul.f32 0.09090909, %v1371_v11  ;;  %v1383_v52 = vmul.f32 %v3152_v27, %v3152_v27 }
 0x37e   :  { %v1368_v36 = vpop.xlane.xlu1 %1367 }
 0x37f   :  { %v3158_v26 = vsub.f32 %v1268_v55, %v1377_v56  ;;  %v1387_v40 = vsel %vm1278_vm9, %v1383_v52, 0.0  ;;  %v1376_v28 = vmul.f32 0.09090909, %v1368_v36 }
 0x380   :  { %1388 = vadd.xlane.f32.xlu0 %v1387_v40 }
 0x381   :  { %v1385_v44 = vmul.f32 %v3158_v26, %v3158_v26  ;;  %v3165_v21 = vsub.f32 %v1267_v13, %v1376_v28 }
 0x382   :  { %v1374_v1 = vpop.xlane.xlu0 %1373 }
 0x383   :  { %v1393_v29 = vsel %vm1278_vm9, %v1385_v44, 0.0  ;;  %v1378_v47 = vmul.f32 0.09090909, %v1374_v1  ;;  %v1384_v6 = vmul.f32 %v3165_v21, %v3165_v21 }
 0x384   :  { %1394 = vadd.xlane.f32.xlu0 %v1393_v29 }
 0x385   :  { %v3172_v55 = vsub.f32 %v1269_v48, %v1378_v47  ;;  %v1390_v60 = vsel %vm1278_vm9, %v1384_v6, 0.0 }
 0x386   :  { %1391 = vadd.xlane.f32.xlu1 %v1390_v60 }
 0x387   :  { %v1386_v17 = vmul.f32 %v3172_v55, %v3172_v55 }
 0x388   :  { %v1449_v9 = vpop.xlane.xlu0 %1448 }
 0x389   :  { %v1459_v13 = vmul.f32 0.09090909, %v1449_v9  ;;  %v1396_v58 = vsel %vm1278_vm9, %v1386_v17, 0.0 }
 0x38a   :  { %1397 = vadd.xlane.f32.xlu1 %v1396_v58 }
 0x38b   :  { %v3180_v53 = vsub.f32 %v1270_v63, %v1459_v13 }
 0x38c   :  { %v1455_v50 = vpop.xlane.xlu0 %1454 }
 0x38d   :  { %v1461_v59 = vmul.f32 0.09090909, %v1455_v50  ;;  %v1467_v62 = vmul.f32 %v3180_v53, %v3180_v53 }
 0x38e   :  { %v1452_v61 = vpop.xlane.xlu1 %1451 }
 0x38f   :  { %v3186_v48 = vsub.f32 %v1272_v34, %v1461_v59  ;;  %v1471_v4 = vsel %vm1278_vm9, %v1467_v62, 0.0  ;;  %v1460_v0 = vmul.f32 0.09090909, %v1452_v61 }
 0x390   :  { %1472 = vadd.xlane.f32.xlu0 %v1471_v4  ;;  %v1533_v24 = vpop.xlane.xlu0 %1532 }
 0x391   :  { %v1543_v38 = vmul.f32 0.09090909, %v1533_v24  ;;  %v1469_v51 = vmul.f32 %v3186_v48, %v3186_v48  ;;  %v3193_v63 = vsub.f32 %v1271_v33, %v1460_v0 }
 0x392   :  { %v1458_v31 = vpop.xlane.xlu1 %1457 }
 0x393   :  { %v3197_v10 = vsub.f32 %v1274_v14, %v1543_v38  ;;  %v1477_v34 = vsel %vm1278_vm9, %v1469_v51, 0.0  ;;  %v1462_v39 = vmul.f32 0.09090909, %v1458_v31  ;;  %v1468_v7 = vmul.f32 %v3193_v63, %v3193_v63 }
 0x394   :  { %1478 = vadd.xlane.f32.xlu0 %v1477_v34  ;;  %v1539_v16 = vpop.xlane.xlu0 %1538 }
 0x395   :  { %v1545_v18 = vmul.f32 0.09090909, %v1539_v16  ;;  %v1551_v22 = vmul.f32 %v3197_v10, %v3197_v10  ;;  %v3206_v2 = vsub.f32 %v1273_v45, %v1462_v39  ;;  %v1474_v8 = vsel %vm1278_vm9, %v1468_v7, 0.0 }
 0x396   :  { %v1536_v14 = vpop.xlane.xlu1 %1535  ;;  %1475 = vadd.xlane.f32.xlu1 %v1474_v8 }
 0x397   :  { %v3211_v33 = vsub.f32 %v1276_v32, %v1545_v18  ;;  %v1555_v46 = vsel %vm1278_vm9, %v1551_v22, 0.0  ;;  %v1544_v57 = vmul.f32 0.09090909, %v1536_v14  ;;  %v1470_v43 = vmul.f32 %v3206_v2, %v3206_v2 }
 0x398   :  { %1556 = vadd.xlane.f32.xlu0 %v1555_v46 }
 0x399   :  { %v1553_v20 = vmul.f32 %v3211_v33, %v3211_v33  ;;  %v3220_v45 = vsub.f32 %v1275_v3, %v1544_v57  ;;  %v1480_v35 = vsel %vm1278_vm9, %v1470_v43, 0.0 }
 0x39a   :  { %v1542_v32 = vpop.xlane.xlu1 %1541  ;;  %1481 = vadd.xlane.f32.xlu1 %v1480_v35 }
 0x39b   :  { %v1561_v23 = vsel %vm1278_vm9, %v1553_v20, 0.0  ;;  %v1546_v11 = vmul.f32 0.09090909, %v1542_v32  ;;  %v1552_v56 = vmul.f32 %v3220_v45, %v3220_v45 }
 0x39c   :  { %1562 = vadd.xlane.f32.xlu0 %v1561_v23 }
 0x39d   :  { %v3228_v52 = vsub.f32 %v1277_v12, %v1546_v11  ;;  %v1558_v36 = vsel %vm1278_vm9, %v1552_v56, 0.0 }
 0x39e   :  { %1559 = vadd.xlane.f32.xlu1 %v1558_v36 }
 0x39f   :  { %v1554_v25 = vmul.f32 %v3228_v52, %v3228_v52 }
 0x3a1   :  { %v1564_v3 = vsel %vm1278_vm9, %v1554_v25, 0.0 }
 0x3a2   :  { %1565 = vadd.xlane.f32.xlu1 %v1564_v3 }
 0x3b8   :  { %v1281_v40 = vpop.xlane.xlu0 %1280 }
 0x3b9   :  { %v1291_v28 = vmul.f32 0.09090909, %v1281_v40 }
 0x3bb   :  { %v3236_v44 = vsub.f32 %v1262_v15, %v1291_v28 }
 0x3bc   :  { %v1287_v29 = vpop.xlane.xlu0 %1286 }
 0x3bd   :  { %v1293_v1 = vmul.f32 0.09090909, %v1287_v29  ;;  %v1299_v54 = vmul.f32 %v3236_v44, %v3236_v44 }
 0x3be   :  { %v1284_v47 = vpop.xlane.xlu1 %1283 }
 0x3bf   :  { %v3242_v12 = vsub.f32 %v1264_v30, %v1293_v1  ;;  %v1303_v6 = vsel %vm1278_vm9, %v1299_v54, 0.0  ;;  %v1292_v60 = vmul.f32 0.09090909, %v1284_v47 }
 0x3c0   :  { %1304 = vadd.xlane.f32.xlu0 %v1303_v6 }
 0x3c1   :  { %v1301_v9 = vmul.f32 %v3242_v12, %v3242_v12  ;;  %v3249_v37 = vsub.f32 %v1263_v19, %v1292_v60 }
 0x3c2   :  { %v1290_v15 = vpop.xlane.xlu1 %1289 }
 0x3c3   :  { %v1309_v17 = vsel %vm1278_vm9, %v1301_v9, 0.0  ;;  %v1294_v13 = vmul.f32 0.09090909, %v1290_v15  ;;  %v1300_v42 = vmul.f32 %v3249_v37, %v3249_v37 }
 0x3c4   :  { %1310 = vadd.xlane.f32.xlu0 %v1309_v17 }
 0x3c5   :  { %v3256_v30 = vsub.f32 %v1265_v41, %v1294_v13  ;;  %v1306_v58 = vsel %vm1278_vm9, %v1300_v42, 0.0 }
 0x3c6   :  { %1307 = vadd.xlane.f32.xlu1 %v1306_v58 }
 0x3c7   :  { %v1302_v5 = vmul.f32 %v3256_v30, %v3256_v30 }
 0x3c9   :  { %v1312_v19 = vsel %vm1278_vm9, %v1302_v5, 0.0 }
 0x3ca   :  { %1313 = vadd.xlane.f32.xlu1 %v1312_v19 }
 0x409   :  { %v1389_v50 = vpop.xlane.xlu0 %1388 }
 0x40a   :  { %v1399_v59 = vmul.f32 0.1, %v1389_v50 }
 0x40c   :  { %1862 = vrsqrt.f32 %v1399_v59  ;;  %vm1405_vm10 = vcmp.eq.f32.partialorder %v1399_v59, inf  ;;  %v1408_v34 = vand.u32 2147483648, %v1399_v59  ;;  %vm1407_vm11 = vcmp.eq.f32.partialorder %v1399_v59, 0.0 }
 0x40d   :  { %v1395_v62 = vpop.xlane.xlu0 %1394 }
 0x40e   :  { %v1401_v61 = vmul.f32 0.1, %v1395_v62 }
 0x40f   :  { %v1392_v4 = vpop.xlane.xlu1 %1391 }
 0x410   :  { %1864 = vrsqrt.f32 %v1401_v61  ;;  %v1400_v0 = vmul.f32 0.1, %v1392_v4  ;;  %vm1419_vm12 = vcmp.eq.f32.partialorder %v1401_v61, inf  ;;  %v1422_v46 = vand.u32 2147483648, %v1401_v61 }
 0x411   :  { %vm1421_vm13 = vcmp.eq.f32.partialorder %v1401_v61, 0.0 }
 0x412   :  { %1866 = vrsqrt.f32 %v1400_v0  ;;  %vm1412_vm14 = vcmp.eq.f32.partialorder %v1400_v0, inf  ;;  %v1415_v36 = vand.u32 2147483648, %v1400_v0  ;;  %vm1414_vm15 = vcmp.eq.f32.partialorder %v1400_v0, 0.0 }
 0x413   :  { %v1398_v49 = vpop.xlane.xlu1 %1397 }
 0x414   :  { %v1402_v41 = vmul.f32 0.1, %v1398_v49 }
 0x416   :  { %1868 = vrsqrt.f32 %v1402_v41  ;;  %vm1426_vm0 = vcmp.eq.f32.partialorder %v1402_v41, inf  ;;  %v1429_v6 = vand.u32 2147483648, %v1402_v41  ;;  %vm1428_vm1 = vcmp.eq.f32.partialorder %v1402_v41, 0.0 }
 0x419   :  { %v1863_v24 = vpop.eup %1862  ;;  %v1473_v38 = vpop.xlane.xlu0 %1472 }
 0x41a   :  { %v1404_v51 = vmul.f32 %v1863_v24, %v1399_v59  ;;  %v3262_v31 = vmul.f32 0.1, %v1473_v38 }
 0x41c   :  { %v1406_v39 = vsel %vm1405_vm10, %v1399_v59, %v1404_v51  ;;  %1870 = vrsqrt.f32 %v3262_v31  ;;  %vm1489_vm2 = vcmp.eq.f32.partialorder %v3262_v31, inf  ;;  %v1492_v50 = vand.u32 2147483648, %v3262_v31 }
 0x41d   :  { %v1865_v16 = vpop.eup %1864  ;;  %v1409_v7 = vsel %vm1407_vm11, %v1408_v34, %v1406_v39  ;;  %v1479_v18 = vpop.xlane.xlu0 %1478  ;;  %vm1491_vm3 = vcmp.eq.f32.partialorder %v3262_v31, 0.0 }
 0x41e   :  { %v1431_v22 = vadd.f32 0.001, %v1409_v7  ;;  %v1418_v8 = vmul.f32 %v1865_v16, %v1401_v61  ;;  %v3265_v14 = vmul.f32 0.1, %v1479_v18 }
 0x41f   :  { %v1867_v57 = vpop.eup %1866  ;;  %v1476_v20 = vpop.xlane.xlu1 %1475 }
 0x420   :  { %v1420_v43 = vsel %vm1419_vm12, %v1401_v61, %v1418_v8  ;;  %1872 = vrsqrt.f32 %v3265_v14  ;;  %v1411_v32 = vmul.f32 %v1867_v57, %v1400_v0  ;;  %v3268_v23 = vmul.f32 0.1, %v1476_v20 }
 0x421   :  { %v1423_v35 = vsel %vm1421_vm13, %v1422_v46, %v1420_v43  ;;  %v1557_v11 = vpop.xlane.xlu0 %1556  ;;  %1874 = vrcp.f32 %v1431_v22  ;;  %vm1503_vm4 = vcmp.eq.f32.partialorder %v3265_v14, inf  ;;  %v1506_v38 = vand.u32 2147483648, %v3265_v14 }
 0x422   :  { %v1433_v56 = vadd.f32 0.001, %v1423_v35  ;;  %v3270_v25 = vmul.f32 0.1, %v1557_v11  ;;  %v1413_v3 = vsel %vm1412_vm14, %v1400_v0, %v1411_v32  ;;  %1876 = vrsqrt.f32 %v3268_v23 }
 0x423   :  { %v1869_v40 = vpop.eup %1868  ;;  %v1416_v28 = vsel %vm1414_vm15, %v1415_v36, %v1413_v3  ;;  %v1482_v29 = vpop.xlane.xlu1 %1481  ;;  %vm1505_vm5 = vcmp.eq.f32.partialorder %v3265_v14, 0.0  ;;  %vm1496_vm6 = vcmp.eq.f32.partialorder %v3268_v23, inf  ;;  %v1499_v22 = vand.u32 2147483648, %v3268_v23 }
 0x424   :  { %1878 = vrsqrt.f32 %v3270_v25  ;;  %v1432_v1 = vadd.f32 0.001, %v1416_v28  ;;  %v1425_v54 = vmul.f32 %v1869_v40, %v1402_v41  ;;  %v3274_v60 = vmul.f32 0.1, %v1482_v29 }
 0x425   :  { %v1563_v47 = vpop.xlane.xlu0 %1562  ;;  %1880 = vrcp.f32 %v1433_v56  ;;  %vm1498_vm7 = vcmp.eq.f32.partialorder %v3268_v23, 0.0  ;;  %vm1573_vm8 = vcmp.eq.f32.partialorder %v3270_v25, inf  ;;  %vm1575_vm10 = vcmp.eq.f32.partialorder %v3270_v25, 0.0 }
 0x426   :  { %v3276_v9 = vmul.f32 0.1, %v1563_v47  ;;  %v1427_v15 = vsel %vm1426_vm0, %v1402_v41, %v1425_v54  ;;  %1882 = vrcp.f32 %v1432_v1  ;;  %vm1510_vm11 = vcmp.eq.f32.partialorder %v3274_v60, inf }
 0x427   :  { %v1430_v17 = vsel %vm1428_vm1, %v1429_v6, %v1427_v15  ;;  %1884 = vrsqrt.f32 %v3274_v60  ;;  %v1560_v13 = vpop.xlane.xlu1 %1559  ;;  %vm1512_vm12 = vcmp.eq.f32.partialorder %v3274_v60, 0.0  ;;  %v1513_v40 = vand.u32 2147483648, %v3274_v60 }
 0x428   :  { %v1434_v58 = vadd.f32 0.001, %v1430_v17  ;;  %1886 = vrsqrt.f32 %v3276_v9  ;;  %v3281_v19 = vmul.f32 0.1, %v1560_v13  ;;  %vm1587_vm13 = vcmp.eq.f32.partialorder %v3276_v9, inf }
 0x429   :  { %v1871_v42 = vpop.eup %1870  ;;  %vm1589_vm14 = vcmp.eq.f32.partialorder %v3276_v9, 0.0 }
 0x42a   :  { %v1488_v5 = vmul.f32 %v1871_v42, %v3262_v31  ;;  %1888 = vrsqrt.f32 %v3281_v19  ;;  %vm1580_vm15 = vcmp.eq.f32.partialorder %v3281_v19, inf  ;;  %vm1582_vm0 = vcmp.eq.f32.partialorder %v3281_v19, 0.0 }
 0x42b   :  { %v1566_v62 = vpop.xlane.xlu1 %1565  ;;  %1890 = vrcp.f32 %v1434_v58 }
 0x42c   :  { %v1490_v59 = vsel %vm1489_vm2, %v3262_v31, %v1488_v5  ;;  %v3288_v0 = vmul.f32 0.1, %v1566_v62 }
 0x42d   :  { %v1873_v61 = vpop.eup %1872  ;;  %v1493_v4 = vsel %vm1491_vm3, %v1492_v50, %v1490_v59 }
 0x42e   :  { %v1515_v49 = vadd.f32 0.001, %v1493_v4  ;;  %v1502_v41 = vmul.f32 %v1873_v61, %v3265_v14  ;;  %v1875_v24 = vpop.eup %1874  ;;  %1892 = vrsqrt.f32 %v3288_v0  ;;  %vm1594_vm1 = vcmp.eq.f32.partialorder %v3288_v0, inf }
 0x42f   :  { %v1877_v51 = vpop.eup %1876  ;;  %v1443_v34 = vmul.f32 %v1875_v24, %v3152_v27  ;;  %v1576_v27 = vand.u32 2147483648, %v3270_v25  ;;  %v1597_v61 = vand.u32 2147483648, %v3288_v0  ;;  %vm1596_vm2 = vcmp.eq.f32.partialorder %v3288_v0, 0.0 }
 0x430   :  { %v1504_v31 = vsel %vm1503_vm4, %v3265_v14, %v1502_v41  ;;  %1894 = vrcp.f32 %v1515_v49  ;;  %v1495_v7 = vmul.f32 %v1877_v51, %v3268_v23 }
 0x431   :  { %v1879_v39 = vpop.eup %1878  ;;  %v1507_v16 = vsel %vm1505_vm5, %v1506_v38, %v1504_v31  ;;  %1619 = vrot.lane.b32.xlu0 %v1443_v34, %s1966_s1 }
 0x432   :  { %v1517_v18 = vadd.f32 0.001, %v1507_v16  ;;  %v1572_v8 = vmul.f32 %v1879_v39, %v3270_v25  ;;  %v1881_v46 = vpop.eup %1880  ;;  %v1497_v14 = vsel %vm1496_vm6, %v3268_v23, %v1495_v7 }
 0x433   :  { %v1883_v57 = vpop.eup %1882  ;;  %v1500_v43 = vsel %vm1498_vm7, %v1499_v22, %v1497_v14  ;;  %v1445_v47 = vmul.f32 %v1881_v46, %v3158_v26 }
 0x434   :  { %v1574_v20 = vsel %vm1573_vm8, %v3270_v25, %v1572_v8  ;;  %1896 = vrcp.f32 %v1517_v18  ;;  %v1885_v35 = vpop.eup %1884  ;;  %v1516_v32 = vadd.f32 0.001, %v1500_v43  ;;  %v1444_v56 = vmul.f32 %v1883_v57, %v3165_v21 }
 0x435   :  { %v1577_v11 = vsel %vm1575_vm10, %v1576_v27, %v1574_v20  ;;  %v1887_v36 = vpop.eup %1886  ;;  %v1509_v23 = vmul.f32 %v1885_v35, %v3274_v60  ;;  %v1590_v21 = vand.u32 2147483648, %v3276_v9 }
 0x436   :  { %v1599_v3 = vadd.f32 0.001, %v1577_v11  ;;  %v1586_v28 = vmul.f32 %v1887_v36, %v3276_v9  ;;  %1621 = vrot.lane.b32.xlu1 %v1444_v56, %s1966_s1  ;;  %1898 = vrcp.f32 %v1516_v32 }
 0x437   :  { %v1511_v25 = vsel %vm1510_vm11, %v3274_v60, %v1509_v23  ;;  %v1889_v29 = vpop.eup %1888  ;;  %v1583_v60 = vand.u32 2147483648, %v3281_v19 }
 0x438   :  { %1900 = vrcp.f32 %v1599_v3  ;;  %v1514_v1 = vsel %vm1512_vm12, %v1513_v40, %v1511_v25  ;;  %v1588_v54 = vsel %vm1587_vm13, %v3276_v9, %v1586_v28  ;;  %v1891_v6 = vpop.eup %1890  ;;  %v1579_v13 = vmul.f32 %v1889_v29, %v3281_v19 }
 0x439   :  { %v1518_v15 = vadd.f32 0.001, %v1514_v1  ;;  %v1591_v17 = vsel %vm1589_vm14, %v1590_v21, %v1588_v54  ;;  %v1446_v59 = vmul.f32 %v1891_v6, %v3172_v55  ;;  %vm1667_vm12 = vcmask 179200  }
 0x43a   :  { %v1601_v42 = vadd.f32 0.001, %v1591_v17  ;;  %1623 = vrot.lane.b32.xlu1 %v1445_v47, %s1966_s1  ;;  %v1581_v5 = vsel %vm1580_vm15, %v3281_v19, %v1579_v13  ;;  %vm1672_vm13 = vcmask 269312   ;;  %vm1681_vm14 = vcmask 359424  }
 0x43b   :  { %v1893_v58 = vpop.eup %1892  ;;  %1902 = vrcp.f32 %v1518_v15  ;;  %v1584_v26 = vsel %vm1582_vm0, %v1583_v60, %v1581_v5 }
 0x43c   :  { %v1593_v50 = vmul.f32 %v1893_v58, %v3288_v0  ;;  %1904 = vrcp.f32 %v1601_v42  ;;  %v1600_v62 = vadd.f32 0.001, %v1584_v26 }
 0x43d   :  { %v1895_v9 = vpop.eup %1894 }
 0x43e   :  { %v1527_v4 = vmul.f32 %v1895_v9, %v3180_v53  ;;  %v1595_v49 = vsel %vm1594_vm1, %v3288_v0, %v1593_v50  ;;  %1625 = vrot.lane.b32.xlu1 %v1446_v59, %s1966_s1  ;;  %1906 = vrcp.f32 %v1600_v62 }
 0x43f   :  { %v1598_v19 = vsel %vm1596_vm2, %v1597_v61, %v1595_v49 }
 0x440   :  { %1635 = vrot.lane.b32.xlu0 %v1527_v4, %s1967_s24  ;;  %v1602_v55 = vadd.f32 0.001, %v1598_v19 }
 0x441   :  { %v1897_v41 = vpop.eup %1896 }
 0x442   :  { %v1529_v24 = vmul.f32 %v1897_v41, %v3186_v48  ;;  %1908 = vrcp.f32 %v1602_v55 }
 0x443   :  { %v1899_v38 = vpop.eup %1898 }
 0x444   :  { %1639 = vrot.lane.b32.xlu0 %v1529_v24, %s1967_s24  ;;  %v1528_v53 = vmul.f32 %v1899_v38, %v3193_v63 }
 0x445   :  { %v1901_v51 = vpop.eup %1900 }
 0x446   :  { %v1611_v31 = vmul.f32 %v1901_v51, %v3197_v10  ;;  %1637 = vrot.lane.b32.xlu1 %v1528_v53, %s1967_s24 }
 0x448   :  { %1651 = vrot.lane.b32.xlu0 %v1611_v31, %s1968_s25  ;;  %v1903_v0 = vpop.eup %1902 }
 0x449   :  { %v1905_v34 = vpop.eup %1904  ;;  %v1530_v39 = vmul.f32 %v1903_v0, %v3206_v2  ;;  %v1305_v10 = vpop.xlane.xlu0 %1304 }
 0x44a   :  { %v1613_v16 = vmul.f32 %v1905_v34, %v3211_v33  ;;  %v1315_v8 = vmul.f32 0.1, %v1305_v10 }
 0x44b   :  { %1641 = vrot.lane.b32.xlu1 %v1530_v39, %s1967_s24  ;;  %v1907_v7 = vpop.eup %1906 }
 0x44c   :  { %1655 = vrot.lane.b32.xlu0 %v1613_v16, %s1968_s25  ;;  %v1612_v48 = vmul.f32 %v1907_v7, %v3220_v45  ;;  %1910 = vrsqrt.f32 %v1315_v8  ;;  %vm1321_vm3 = vcmp.eq.f32.partialorder %v1315_v8, inf  ;;  %v1324_v56 = vand.u32 2147483648, %v1315_v8 }
 0x44d   :  { %v1311_v46 = vpop.xlane.xlu0 %1310  ;;  %vm1323_vm4 = vcmp.eq.f32.partialorder %v1315_v8, 0.0 }
 0x44e   :  { %v1317_v14 = vmul.f32 0.1, %v1311_v46 }
 0x44f   :  { %v1909_v18 = vpop.eup %1908  ;;  %1653 = vrot.lane.b32.xlu1 %v1612_v48, %s1968_s25  ;;  %v1308_v22 = vpop.xlane.xlu1 %1307 }
 0x450   :  { %v1614_v63 = vmul.f32 %v1909_v18, %v3228_v52  ;;  %v1316_v27 = vmul.f32 0.1, %v1308_v22  ;;  %1912 = vrsqrt.f32 %v1317_v14  ;;  %vm1335_vm5 = vcmp.eq.f32.partialorder %v1317_v14, inf }
 0x451   :  { %v1338_v23 = vand.u32 2147483648, %v1317_v14  ;;  %vm1337_vm7 = vcmp.eq.f32.partialorder %v1317_v14, 0.0 }
 0x452   :  { %1914 = vrsqrt.f32 %v1316_v27  ;;  %vm1328_vm6 = vcmp.eq.f32.partialorder %v1316_v27, inf  ;;  %v1331_v25 = vand.u32 2147483648, %v1316_v27  ;;  %vm1330_vm8 = vcmp.eq.f32.partialorder %v1316_v27, 0.0 }
 0x453   :  { %1657 = vrot.lane.b32.xlu1 %v1614_v63, %s1968_s25  ;;  %v1314_v2 = vpop.xlane.xlu1 %1313 }
 0x454   :  { %v1318_v33 = vmul.f32 0.1, %v1314_v2 }
 0x456   :  { %1916 = vrsqrt.f32 %v1318_v33  ;;  %vm1342_vm10 = vcmp.eq.f32.partialorder %v1318_v33, inf  ;;  %v1345_v6 = vand.u32 2147483648, %v1318_v33  ;;  %vm1344_vm11 = vcmp.eq.f32.partialorder %v1318_v33, 0.0 }
 0x459   :  { %v1911_v57 = vpop.eup %1910 }
 0x45a   :  { %v1320_v45 = vmul.f32 %v1911_v57, %v1315_v8 }
 0x45c   :  { %v1322_v52 = vsel %vm1321_vm3, %v1315_v8, %v1320_v45 }
 0x45d   :  { %v1913_v43 = vpop.eup %1912  ;;  %v1325_v36 = vsel %vm1323_vm4, %v1324_v56, %v1322_v52 }
 0x45e   :  { %v1334_v35 = vmul.f32 %v1913_v43, %v1317_v14  ;;  %v1347_v29 = vadd.f32 0.001, %v1325_v36 }
 0x45f   :  { %v1915_v20 = vpop.eup %1914 }
 0x460   :  { %v1327_v32 = vmul.f32 %v1915_v20, %v1316_v27  ;;  %v1336_v3 = vsel %vm1335_vm5, %v1317_v14, %v1334_v35  ;;  %1918 = vrcp.f32 %v1347_v29 }
 0x461   :  { %v1339_v21 = vsel %vm1337_vm7, %v1338_v23, %v1336_v3 }
 0x462   :  { %v1329_v40 = vsel %vm1328_vm6, %v1316_v27, %v1327_v32  ;;  %v1349_v15 = vadd.f32 0.001, %v1339_v21 }
 0x463   :  { %v1917_v11 = vpop.eup %1916  ;;  %v1332_v1 = vsel %vm1330_vm8, %v1331_v25, %v1329_v40 }
 0x464   :  { %v1341_v28 = vmul.f32 %v1917_v11, %v1318_v33  ;;  %v1348_v17 = vadd.f32 0.001, %v1332_v1  ;;  %1920 = vrcp.f32 %v1349_v15 }
 0x466   :  { %v1343_v54 = vsel %vm1342_vm10, %v1318_v33, %v1341_v28  ;;  %1922 = vrcp.f32 %v1348_v17 }
 0x467   :  { %v1346_v13 = vsel %vm1344_vm11, %v1345_v6, %v1343_v54 }
 0x468   :  { %v1350_v58 = vadd.f32 0.001, %v1346_v13 }
 0x46a   :  { %1924 = vrcp.f32 %v1350_v58 }
 0x46d   :  { %v1919_v50 = vpop.eup %1918 }
 0x46e   :  { %v1359_v4 = vmul.f32 %v1919_v50, %v3236_v44 }
 0x471   :  { %v1921_v61 = vpop.eup %1920 }
 0x472   :  { %v1361_v38 = vmul.f32 %v1921_v61, %v3242_v12 }
 0x473   :  { %v1923_v49 = vpop.eup %1922 }
 0x474   :  { %v1360_v24 = vmul.f32 %v1923_v49, %v3249_v37 }
 0x477   :  { %v1925_v53 = vpop.eup %1924 }
 0x478   :  { %v1362_v37 = vmul.f32 %v1925_v53, %v3256_v30 }
 0x4a3   :  { %v1620_v42 = vpop.permute.xlu0 %1619 }
 0x4a4   :  { %v1663_v19 = vsel %vm1278_vm9, %v1359_v4, %v1620_v42 }
 0x4a8   :  { %v1622_v47 = vpop.permute.xlu1 %1621 }
 0x4a9   :  { %v1664_v0 = vsel %vm1278_vm9, %v1360_v24, %v1622_v47 }
 0x4ac   :  { %v1624_v60 = vpop.permute.xlu1 %1623 }
 0x4ad   :  { %v1665_v44 = vsel %vm1278_vm9, %v1361_v38, %v1624_v60 }
 0x4b0   :  { %v1626_v9 = vpop.permute.xlu1 %1625 }
 0x4b1   :  { %v1666_v63 = vsel %vm1278_vm9, %v1362_v37, %v1626_v9 }
 0x4b2   :  { %v1636_v5 = vpop.permute.xlu0 %1635 }
 0x4b3   :  { %v1668_v41 = vsel %vm1667_vm12, %v1663_v19, %v1636_v5 }
 0x4b6   :  { %v1640_v26 = vpop.permute.xlu0 %1639 }
 0x4b7   :  { %v1670_v34 = vsel %vm1667_vm12, %v1665_v44, %v1640_v26 }
 0x4b8   :  { %v1638_v59 = vpop.permute.xlu1 %1637 }
 0x4b9   :  { %v1669_v39 = vsel %vm1667_vm12, %v1664_v0, %v1638_v59 }
 0x4ba   :  { %v1652_v62 = vpop.permute.xlu0 %1651 }
 0x4bb   :  { %v3348_v51 = vsel %vm1672_vm13, %v1668_v41, %v1652_v62 }
 0x4bc   :  { %v1677_v16 = vmul.f32 %v3348_v51, %v3348_v51 }
 0x4bd   :  { %v1642_v55 = vpop.permute.xlu1 %1641 }
 0x4be   :  { %v1656_v31 = vpop.permute.xlu0 %1655  ;;  %v1682_v10 = vsel %vm1681_vm14, %v1677_v16, 0.0  ;;  %v1671_v22 = vsel %vm1667_vm12, %v1666_v63, %v1642_v55 }
 0x4bf   :  { %v1675_v12 = vsel %vm1672_vm13, %v1670_v34, %v1656_v31 }
 0x4c0   :  { %v1679_v8 = vmul.f32 %v1675_v12, %v1675_v12 }
 0x4c1   :  { %v1654_v7 = vpop.permute.xlu1 %1653 }
 0x4c2   :  { %v1674_v48 = vsel %vm1672_vm13, %v1669_v39, %v1654_v7  ;;  %v1693_v33 = vsel %vm1681_vm14, %v1679_v8, 0.0 }
 0x4c3   :  { %v1678_v18 = vmul.f32 %v1674_v48, %v1674_v48 }
 0x4c5   :  { %v1683_v46 = vsel %vm1681_vm14, %v1678_v18, 0.0  ;;  %v1658_v14 = vpop.permute.xlu1 %1657 }
 0x4c6   :  { %v1676_v27 = vsel %vm1672_vm13, %v1671_v22, %v1658_v14  ;;  %v1684_v2 = vadd.f32 %v1683_v46, %v1682_v10 }
 0x4c7   :  { %v1680_v30 = vmul.f32 %v1676_v27, %v1676_v27 }
 0x4c8   :  { %1685 = vadd.xlane.f32.xlu0 %v1684_v2 }
 0x4c9   :  { %v1694_v57 = vsel %vm1681_vm14, %v1680_v30, 0.0 }
 0x4ca   :  { %v1695_v43 = vadd.f32 %v1694_v57, %v1693_v33 }
 0x4cc   :  { %1696 = vadd.xlane.f32.xlu1 %v1695_v43 }
 0x551   :  { %v1686_v45 = vpop.xlane.xlu0 %1685 }
 0x552   :  { %v1687_v20 = vrot.slane %v1686_v45, 4 }
 0x554   :  { %v1688_v35 = vadd.f32 %v1687_v20, %v1686_v45 }
 0x555   :  { %v1697_v52 = vpop.xlane.xlu1 %1696 }
 0x556   :  { %v1689_v32 = vrot.slane %v1688_v35, 2  ;;  %v1698_v11 = vrot.slane %v1697_v52, 4 }
 0x558   :  { %v1690_v56 = vadd.f32 %v1689_v32, %v1688_v35  ;;  %v1699_v36 = vadd.f32 %v1698_v11, %v1697_v52 }
 0x55a   :  { %v1691_v3 = vrot.slane %v1690_v56, 1  ;;  %v1700_v23 = vrot.slane %v1699_v36, 2 }
 0x55c   :  { %v1692_v40 = vadd.f32 %v1691_v3, %v1690_v56  ;;  %v1701_v28 = vadd.f32 %v1700_v23, %v1699_v36 }
 0x55e   :  { %1926 = vrsqrt.f32 %v1692_v40  ;;  %v1702_v25 = vrot.slane %v1701_v28, 1  ;;  %vm1706_vm9 = vcmp.eq.f32.partialorder %v1692_v40, inf  ;;  %v1709_v54 = vand.u32 2147483648, %v1692_v40 }
 0x55f   :  { %vm1708_vm15 = vcmp.eq.f32.partialorder %v1692_v40, 0.0 }
 0x560   :  { %v1703_v21 = vadd.f32 %v1702_v25, %v1701_v28 }
 0x562   :  { %1928 = vrsqrt.f32 %v1703_v21  ;;  %vm1713_vm0 = vcmp.eq.f32.partialorder %v1703_v21, inf  ;;  %v1716_v42 = vand.u32 2147483648, %v1703_v21  ;;  %vm1715_vm1 = vcmp.eq.f32.partialorder %v1703_v21, 0.0 }
 0x56b   :  { %v1927_v29 = vpop.eup %1926 }
 0x56c   :  { %v1705_v1 = vmul.f32 %v1927_v29, %v1692_v40 }
 0x56e   :  { %v1707_v47 = vsel %vm1706_vm9, %v1692_v40, %v1705_v1 }
 0x56f   :  { %v1710_v6 = vsel %vm1708_vm15, %v1709_v54, %v1707_v47  ;;  %v1929_v15 = vpop.eup %1928 }
 0x570   :  { %v1718_v17 = vmax.f32 %v1710_v6, 1e-12  ;;  %v1712_v13 = vmul.f32 %v1929_v15, %v1703_v21 }
 0x572   :  { %1930 = vrcp.f32 %v1718_v17  ;;  %v1714_v60 = vsel %vm1713_vm0, %v1703_v21, %v1712_v13 }
 0x573   :  { %v1717_v58 = vsel %vm1715_vm1, %v1716_v42, %v1714_v60 }
 0x574   :  { %v1719_v5 = vmax.f32 %v1717_v58, 1e-12 }
 0x576   :  { %1932 = vrcp.f32 %v1719_v5 }
 0x57f   :  { %v1931_v9 = vpop.eup %1930 }
 0x580   :  { %v1724_v26 = vmul.f32 %v1931_v9, %v3348_v51  ;;  %v1725_v50 = vmul.f32 %v1931_v9, %v1674_v48 }
 0x582   :  { %1728 = vst.msk [vmem:[#allocation2] sm:$0xff] %vm1681_vm14, %v1724_v26  ;;  %1729 = vst.msk [vmem:[#allocation2 + $0x8] sm:$0xff] %vm1681_vm14, %v1725_v50 }
 0x583   :  { %v1933_v59 = vpop.eup %1932 }
 0x584   :  { %v1726_v62 = vmul.f32 %v1933_v59, %v1675_v12  ;;  %v1727_v61 = vmul.f32 %v1933_v59, %v1676_v27 }
 0x586   :  { %1730 = vst.msk [vmem:[#allocation2 + $0x10] sm:$0xff] %vm1681_vm14, %v1726_v62  ;;  %1731 = vst.msk [vmem:[#allocation2 + $0x18] sm:$0xff] %vm1681_vm14, %v1727_v61 }
 0x587   :  { %1945 = shalt.err (!%p1942_p4)
}
 0x588   :  { %s1970_s26 = smov 128   ;;  %s1971_s7 = smov 8  }
 0x589   :  { %1743 = dma.vmem_to_hbm [thread:$0]  %s1738_s27, 512, %s3376_s2, [#allocation3], %s1970_s26, %s1970_s26, %s1971_s7  }
 0x58a   :  { %1954 = dma.done.wait [#allocation3], 512  }
 0x58b   :  { %1955 = vsyncadd [#allocation3], 4294966784 }
 0x58c   :  { %1747 = vsyncpa [#allocation3], 1 }

</bundles_post_ra>
